<compile_context>
chip_gen: v6e
topology: v6e:2x2x1
jax: 0.10.0
libtpu: 0.0.40
codegen_flags: <defaults>
</compile_context>

<pallas_src>
import functools

import jax
import jax.numpy as jnp
from jax import lax
from jax.experimental import pallas as pl
from jax.experimental.pallas import tpu as pltpu

BN_EPS = 1e-5
LEAKY_SLOPE = 0.2
LANE = 128


def _round_up(x, m):
    return (x + m - 1) // m * m


def _largest_divisor_leq(n, cap):
    cap = int(max(1, min(n, cap)))
    for d in range(cap, 0, -1):
        if n % d == 0:
            return d
    return 1


def _pick_conv_row_tile(H, W, WP, Cin, Cout_p, budget_bytes=2 * 1024 * 1024):
    """Largest divisor of H whose pass-1 per-tile working set fits the budget.

    Budget is kept small so double-buffered tiles fit the scoped-VMEM default on
    every generation (incl. v7x's 64 MiB physical VMEM).
    """
    per_row = (2 * WP * max(Cin, 8)      # bf16 padded-input rows (lane-padded Cin)
               + 4 * W * Cout_p          # f32 accumulator rows
               + 2 * W * Cout_p)         # bf16 conv-output rows
    return _largest_divisor_leq(H, budget_bytes // per_row)


def _pick_bn_row_tile(H, W, Cout_p, budget_bytes=4 * 1024 * 1024):
    per_row = (2 + 4) * W * Cout_p       # bf16 in + f32 out
    return _largest_divisor_leq(H, budget_bytes // per_row)


def _conv_stats_kernel(xb_ref, halo_ref, w_ref, o_ref, stat_ref):
    """One (image, row-tile) grid step of the 3x3 'same' conv + BN partials.

    xb_ref:   (TH, W+2, Cin) bf16   -- padded-input rows [h*TH, h*TH+TH)
    halo_ref: (2, W+2, Cin)  bf16   -- padded-input rows [h*TH+TH, h*TH+TH+2)
    w_ref:    (3, 3, Cin, Cout_p) bf16
    o_ref:    (TH, W, Cout_p) bf16  -- conv output tile (lane-dense Cout_p)
    stat_ref: (2, Cout_p) f32       -- per-tile [sum; sum of squares] per channel
    """
    TH, WP, Cin = xb_ref.shape
    W = WP - 2
    Cout_p = o_ref.shape[-1]

    x = jnp.concatenate([xb_ref[...], halo_ref[...]], axis=0)   # (TH+2, WP, Cin)

    # Hoist the three width (sublane-axis) shifts out of the tap loop: 3 slices, not 9.
    xw = [x[:, kx:kx + W, :] for kx in range(3)]                # each (TH+2, W, Cin)

    # 3x3 conv as 9 accumulated MXU matmuls, bf16 operands, f32 accumulation.
    # NOTE: for small Cin the taps could be folded into a single
    # (TH*W, 9*Cin) @ (9*Cin, Cout_p) contraction to better fill the MXU K depth.
    acc = jnp.zeros((TH * W, Cout_p), jnp.float32)
    for ky in range(3):
        for kx in range(3):
            patch = xw[kx][ky:ky + TH].reshape(TH * W, Cin)
            acc = acc + jnp.dot(patch, w_ref[ky, kx],
                                preferred_element_type=jnp.float32)

    # Per-tile BatchNorm partial statistics (single pass over the f32 accumulator).
    s1 = jnp.sum(acc, axis=0, keepdims=True)
    s2 = jnp.sum(acc * acc, axis=0, keepdims=True)
    stat_ref[...] = jnp.concatenate([s1, s2], axis=0)           # (2, Cout_p)

    o_ref[...] = acc.reshape(TH, W, Cout_p).astype(o_ref.dtype)


def _bn_lrelu_kernel(y_ref, scale_ref, shift_ref, o_ref):
    """Pass 2: y*scale + shift, then LeakyReLU(0.2). Lane-dense, f32 math."""
    y = y_ref[...].astype(jnp.float32) * scale_ref[...] + shift_ref[...]
    o_ref[...] = jnp.where(y > 0, y, LEAKY_SLOPE * y)


@functools.partial(jax.jit, static_argnames=("row_tile",))
def vgg_layer_forward(x_nchw, w_hwio, bias, gamma, beta, *, row_tile=None):
    """x_nchw: (N, Cin, H, W); w_hwio: (3, 3, Cin, Cout). Returns (N, Cout, H, W)."""
    del bias  # Conv bias is cancelled exactly by BatchNorm's batch-mean subtraction.
    N, Cin, H, W = x_nchw.shape
    Cout = w_hwio.shape[-1]
    Cout_p = _round_up(Cout, LANE)
    WP = W + 2

    # NCHW -> NHWC, cast to bf16 for the MXU, zero-pad H/W by 1 (Conv2d padding=1).
    # TODO(synk): fold this spatial pad (an extra HBM copy of the activations) into
    # the kernel via first/last-tile boundary masking instead of pre-padding.
    x_nhwc = jnp.transpose(x_nchw, (0, 2, 3, 1)).astype(jnp.bfloat16)
    x_pad = jnp.pad(x_nhwc, ((0, 0), (1, 1), (1, 1), (0, 0)))

    # Zero-pad Cout up to a lane multiple (128): unmasked stores + full MXU N-dim.
    w_p = jnp.zeros((3, 3, Cin, Cout_p), jnp.bfloat16).at[..., :Cout].set(
        w_hwio.astype(jnp.bfloat16))

    if row_tile is None:
        row_tile = _pick_conv_row_tile(H, W, WP, Cin, Cout_p)
    TH = row_tile
    assert H % TH == 0, (H, TH)
    nh = H // TH

    # Bottom 2-row halo of every row tile, gathered once in the wrapper so the
    # kernel needs no manual DMA and all operands are auto-pipelined.
    row_idx = (jnp.arange(nh) * TH + TH)[:, None] + jnp.arange(2)[None, :]
    x_halo = jnp.take(x_pad, row_idx.reshape(-1), axis=1).reshape(N, nh, 2, WP, Cin)

    flops = 2 * N * H * W * 9 * Cin * Cout_p
    bytes_accessed = (2 * x_pad.size + 2 * x_halo.size + 2 * w_p.size
                      + 2 * N * H * W * Cout_p + 4 * N * nh * 2 * Cout_p)

    # ---- Pass 1: conv + per-tile BN partial statistics --------------------------
    conv_out, stats = pl.pallas_call(
        _conv_stats_kernel,
        out_shape=(jax.ShapeDtypeStruct((N, H, W, Cout_p), jnp.bfloat16),
                   jax.ShapeDtypeStruct((N, nh, 2, Cout_p), jnp.float32)),
        grid_spec=pltpu.PrefetchScalarGridSpec(
            num_scalar_prefetch=0,
            grid=(N, nh),
            in_specs=[
                pl.BlockSpec((None, TH, WP, Cin), lambda n, h: (n, h, 0, 0)),
                pl.BlockSpec((None, None, 2, WP, Cin), lambda n, h: (n, h, 0, 0, 0)),
                pl.BlockSpec((3, 3, Cin, Cout_p), lambda n, h: (0, 0, 0, 0)),
            ],
            out_specs=[
                pl.BlockSpec((None, TH, W, Cout_p), lambda n, h: (n, h, 0, 0)),
                pl.BlockSpec((None, None, 2, Cout_p), lambda n, h: (n, h, 0, 0)),
            ],
        ),
        compiler_params=pltpu.CompilerParams(
            dimension_semantics=("parallel", "parallel")),
        cost_estimate=pl.CostEstimate(flops=flops, transcendentals=0,
                                      bytes_accessed=bytes_accessed),
    )(x_pad, x_halo, w_p)

    # ---- Finalize BatchNorm batch statistics (training mode, biased variance) ---
    cnt = jnp.float32(N * H * W)
    tot = jnp.sum(stats, axis=(0, 1))                 # (2, Cout_p)
    mean = tot[0] / cnt
    var = jnp.maximum(tot[1] / cnt - mean * mean, 0.0)
    gamma_p = jnp.zeros((Cout_p,), jnp.float32).at[:Cout].set(gamma.astype(jnp.float32))
    beta_p = jnp.zeros((Cout_p,), jnp.float32).at[:Cout].set(beta.astype(jnp.float32))
    inv_std = lax.rsqrt(var + BN_EPS)
    scale = (gamma_p * inv_std).reshape(1, Cout_p)
    shift = (beta_p - mean * gamma_p * inv_std).reshape(1, Cout_p)

    # ---- Pass 2: normalize + LeakyReLU (elementwise, bigger row tiles) ----------
    TH2 = _pick_bn_row_tile(H, W, Cout_p)
    nh2 = H // TH2
    y = pl.pallas_call(
        _bn_lrelu_kernel,
        out_shape=jax.ShapeDtypeStruct((N, H, W, Cout_p), jnp.float32),
        grid_spec=pltpu.PrefetchScalarGridSpec(
            num_scalar_prefetch=0,
            grid=(N, nh2),
            in_specs=[
                pl.BlockSpec((None, TH2, W, Cout_p), lambda n, h: (n, h, 0, 0)),
                pl.BlockSpec((1, Cout_p), lambda n, h: (0, 0)),
                pl.BlockSpec((1, Cout_p), lambda n, h: (0, 0)),
            ],
            out_specs=pl.BlockSpec((None, TH2, W, Cout_p), lambda n, h: (n, h, 0, 0)),
        ),
        compiler_params=pltpu.CompilerParams(
            dimension_semantics=("parallel", "parallel")),
        cost_estimate=pl.CostEstimate(
            flops=4 * N * H * W * Cout_p, transcendentals=0,
            bytes_accessed=6 * N * H * W * Cout_p + 8 * Cout_p),
    )(conv_out, scale, shift)

    # Drop the channel padding, NHWC -> NCHW to match the PyTorch module.
    return jnp.transpose(y[..., :Cout], (0, 3, 1, 2))


def _reference_forward(x_nchw, w_hwio, bias, gamma, beta):
    """Pure-JAX f32 reference of Conv2d(3,1,1) + BatchNorm2d(train) + LeakyReLU(0.2)."""
    w_oihw = jnp.transpose(w_hwio, (3, 2, 0, 1))  # (Cout, Cin, 3, 3)
    y = lax.conv_general_dilated(
        x_nchw, w_oihw, window_strides=(1, 1), padding=((1, 1), (1, 1)),
        dimension_numbers=("NCHW", "OIHW", "NCHW"),
        precision=lax.Precision.HIGHEST)
    y = y + bias.reshape(1, -1, 1, 1)
    mean = jnp.mean(y, axis=(0, 2, 3), keepdims=True)
    var = jnp.mean((y - mean) ** 2, axis=(0, 2, 3), keepdims=True)
    y = (y - mean) * lax.rsqrt(var + BN_EPS)
    y = y * gamma.reshape(1, -1, 1, 1) + beta.reshape(1, -1, 1, 1)
    return jnp.where(y > 0, y, LEAKY_SLOPE * y)


if __name__ == "__main__":
    # Small shapes consistent with the module: vgg_layer(nin=4, nout=8) on (2, 4, 16, 16).
    N, Cin, H, W, Cout = 2, 4, 16, 16, 8

    key = jax.random.PRNGKey(0)
    kx_, kw, kb, kg, kbt = jax.random.split(key, 5)

    x = jax.random.normal(kx_, (N, Cin, H, W), jnp.float32)

    # Deterministic parameter init (Conv2d-style uniform fan-in scaling).
    fan_in = Cin * 3 * 3
    bound = 1.0 / (fan_in ** 0.5)
    w_hwio = jax.random.uniform(kw, (3, 3, Cin, Cout), jnp.float32, -bound, bound)
    bias = jax.random.uniform(kb, (Cout,), jnp.float32, -bound, bound)
    gamma = 1.0 + 0.1 * jax.random.normal(kg, (Cout,), jnp.float32)
    beta = 0.1 * jax.random.normal(kbt, (Cout,), jnp.float32)

    # row_tile=8 -> pass-1 grid (N=2, nh=2): exercises the multi-tile halo path.
    out = vgg_layer_forward(x, w_hwio, bias, gamma, beta, row_tile=8)
    out = jax.block_until_ready(out)

    ref = _reference_forward(x, w_hwio, bias, gamma, beta)
    assert out.shape == (N, Cout, H, W), out.shape
    # bf16 MXU operands / bf16 conv intermediate (f32 accumulation & statistics)
    # vs. a full-f32 reference: allow bf16-level rounding in the comparison.
    err = float(jnp.max(jnp.abs(out - ref)))
    assert jnp.allclose(out, ref, rtol=2e-2, atol=2e-2), err

    print("KERNEL_OK")
</pallas_src>

<mosaic_0001>
module attributes {stable_mosaic.version = 11 : i64} {
  func.func @_conv_stats_kernel(%arg0: i32, %arg1: i32, %arg2: memref<1x8x18x4xbf16, #tpu.memory_space<vmem>>, %arg3: memref<1x1x2x18x4xbf16, #tpu.memory_space<vmem>>, %arg4: memref<3x3x4x128xbf16, #tpu.memory_space<vmem>>, %arg5: memref<1x8x16x128xbf16, #tpu.memory_space<vmem>>, %arg6: memref<1x1x2x128xf32, #tpu.memory_space<vmem>>) attributes {dimension_semantics = [#tpu.dimension_semantics<parallel>, #tpu.dimension_semantics<parallel>], iteration_bounds = array<i64: 2, 2>, scalar_prefetch = 0 : i64, scratch_operands = 0 : i64, tpu.core_type = #tpu.core_type<tc>, window_params = [{transform_indices = @transform_0, window_bounds = array<i64: 1, 8, 18, 4>}, {transform_indices = @transform_1, window_bounds = array<i64: 1, 1, 2, 18, 4>}, {pipeline_mode = #tpu.pipeline_mode<synchronous>, transform_indices = @transform_2, window_bounds = array<i64: 3, 3, 4, 128>}, {transform_indices = @transform_3, window_bounds = array<i64: 1, 8, 16, 128>}, {transform_indices = @transform_4, window_bounds = array<i64: 1, 1, 2, 128>}]} {
    %c0 = arith.constant 0 : index
    %c0_0 = arith.constant 0 : index
    %c0_1 = arith.constant 0 : index
    %c0_2 = arith.constant 0 : index
    %0 = vector.load %arg2[%c0, %c0_0, %c0_1, %c0_2] : memref<1x8x18x4xbf16, #tpu.memory_space<vmem>>, vector<1x8x18x4xbf16>
    %1 = vector.shape_cast %0 : vector<1x8x18x4xbf16> to vector<8x18x4xbf16>
    %c0_3 = arith.constant 0 : index
    %c0_4 = arith.constant 0 : index
    %c0_5 = arith.constant 0 : index
    %c0_6 = arith.constant 0 : index
    %c0_7 = arith.constant 0 : index
    %2 = vector.load %arg3[%c0_3, %c0_4, %c0_5, %c0_6, %c0_7] : memref<1x1x2x18x4xbf16, #tpu.memory_space<vmem>>, vector<1x1x2x18x4xbf16>
    %3 = vector.shape_cast %2 : vector<1x1x2x18x4xbf16> to vector<2x18x4xbf16>
    %4 = tpu.concatenate %1, %3 in 0 : vector<8x18x4xbf16>, vector<2x18x4xbf16> -> vector<10x18x4xbf16>
    %5 = vector.extract_strided_slice %4 {offsets = [0, 0, 0], sizes = [10, 16, 4], strides = [1, 1, 1]} : vector<10x18x4xbf16> to vector<10x16x4xbf16>
    %6 = vector.extract_strided_slice %4 {offsets = [0, 1, 0], sizes = [10, 16, 4], strides = [1, 1, 1]} : vector<10x18x4xbf16> to vector<10x16x4xbf16>
    %7 = vector.extract_strided_slice %4 {offsets = [0, 2, 0], sizes = [10, 16, 4], strides = [1, 1, 1]} : vector<10x18x4xbf16> to vector<10x16x4xbf16>
    %cst = arith.constant 0.000000e+00 : f32
    %8 = vector.broadcast %cst : f32 to vector<128x128xf32>
    %9 = vector.extract_strided_slice %5 {offsets = [0, 0, 0], sizes = [8, 16, 4], strides = [1, 1, 1]} : vector<10x16x4xbf16> to vector<8x16x4xbf16>
    %10 = vector.shape_cast %9 : vector<8x16x4xbf16> to vector<128x4xbf16>
    %c0_8 = arith.constant 0 : index
    %c0_9 = arith.constant 0 : index
    %c0_10 = arith.constant 0 : index
    %c0_11 = arith.constant 0 : index
    %11 = vector.load %arg4[%c0_8, %c0_9, %c0_10, %c0_11] : memref<3x3x4x128xbf16, #tpu.memory_space<vmem>>, vector<1x1x4x128xbf16>
    %12 = vector.shape_cast %11 : vector<1x1x4x128xbf16> to vector<4x128xbf16>
    %cst_12 = arith.constant dense<0.000000e+00> : vector<128x128xf32>
    %13 = tpu.matmul %10, %12, %cst_12 {dimension_numbers = #tpu.dot_dimension_numbers<[1], [0], [0], [1], [0, 0, 1, 1], [], []>} : vector<128x4xbf16>, vector<4x128xbf16>, vector<128x128xf32> -> vector<128x128xf32>
    %14 = arith.addf %8, %13 : vector<128x128xf32>
    %15 = vector.extract_strided_slice %6 {offsets = [0, 0, 0], sizes = [8, 16, 4], strides = [1, 1, 1]} : vector<10x16x4xbf16> to vector<8x16x4xbf16>
    %16 = vector.shape_cast %15 : vector<8x16x4xbf16> to vector<128x4xbf16>
    %c0_13 = arith.constant 0 : index
    %c1 = arith.constant 1 : index
    %c0_14 = arith.constant 0 : index
    %c0_15 = arith.constant 0 : index
    %17 = vector.load %arg4[%c0_13, %c1, %c0_14, %c0_15] : memref<3x3x4x128xbf16, #tpu.memory_space<vmem>>, vector<1x1x4x128xbf16>
    %18 = vector.shape_cast %17 : vector<1x1x4x128xbf16> to vector<4x128xbf16>
    %cst_16 = arith.constant dense<0.000000e+00> : vector<128x128xf32>
    %19 = tpu.matmul %16, %18, %cst_16 {dimension_numbers = #tpu.dot_dimension_numbers<[1], [0], [0], [1], [0, 0, 1, 1], [], []>} : vector<128x4xbf16>, vector<4x128xbf16>, vector<128x128xf32> -> vector<128x128xf32>
    %20 = arith.addf %14, %19 : vector<128x128xf32>
    %21 = vector.extract_strided_slice %7 {offsets = [0, 0, 0], sizes = [8, 16, 4], strides = [1, 1, 1]} : vector<10x16x4xbf16> to vector<8x16x4xbf16>
    %22 = vector.shape_cast %21 : vector<8x16x4xbf16> to vector<128x4xbf16>
    %c0_17 = arith.constant 0 : index
    %c2 = arith.constant 2 : index
    %c0_18 = arith.constant 0 : index
    %c0_19 = arith.constant 0 : index
    %23 = vector.load %arg4[%c0_17, %c2, %c0_18, %c0_19] : memref<3x3x4x128xbf16, #tpu.memory_space<vmem>>, vector<1x1x4x128xbf16>
    %24 = vector.shape_cast %23 : vector<1x1x4x128xbf16> to vector<4x128xbf16>
    %cst_20 = arith.constant dense<0.000000e+00> : vector<128x128xf32>
    %25 = tpu.matmul %22, %24, %cst_20 {dimension_numbers = #tpu.dot_dimension_numbers<[1], [0], [0], [1], [0, 0, 1, 1], [], []>} : vector<128x4xbf16>, vector<4x128xbf16>, vector<128x128xf32> -> vector<128x128xf32>
    %26 = arith.addf %20, %25 : vector<128x128xf32>
    %27 = vector.extract_strided_slice %5 {offsets = [1, 0, 0], sizes = [8, 16, 4], strides = [1, 1, 1]} : vector<10x16x4xbf16> to vector<8x16x4xbf16>
    %28 = vector.shape_cast %27 : vector<8x16x4xbf16> to vector<128x4xbf16>
    %c1_21 = arith.constant 1 : index
    %c0_22 = arith.constant 0 : index
    %c0_23 = arith.constant 0 : index
    %c0_24 = arith.constant 0 : index
    %29 = vector.load %arg4[%c1_21, %c0_22, %c0_23, %c0_24] : memref<3x3x4x128xbf16, #tpu.memory_space<vmem>>, vector<1x1x4x128xbf16>
    %30 = vector.shape_cast %29 : vector<1x1x4x128xbf16> to vector<4x128xbf16>
    %cst_25 = arith.constant dense<0.000000e+00> : vector<128x128xf32>
    %31 = tpu.matmul %28, %30, %cst_25 {dimension_numbers = #tpu.dot_dimension_numbers<[1], [0], [0], [1], [0, 0, 1, 1], [], []>} : vector<128x4xbf16>, vector<4x128xbf16>, vector<128x128xf32> -> vector<128x128xf32>
    %32 = arith.addf %26, %31 : vector<128x128xf32>
    %33 = vector.extract_strided_slice %6 {offsets = [1, 0, 0], sizes = [8, 16, 4], strides = [1, 1, 1]} : vector<10x16x4xbf16> to vector<8x16x4xbf16>
    %34 = vector.shape_cast %33 : vector<8x16x4xbf16> to vector<128x4xbf16>
    %c1_26 = arith.constant 1 : index
    %c1_27 = arith.constant 1 : index
    %c0_28 = arith.constant 0 : index
    %c0_29 = arith.constant 0 : index
    %35 = vector.load %arg4[%c1_26, %c1_27, %c0_28, %c0_29] : memref<3x3x4x128xbf16, #tpu.memory_space<vmem>>, vector<1x1x4x128xbf16>
    %36 = vector.shape_cast %35 : vector<1x1x4x128xbf16> to vector<4x128xbf16>
    %cst_30 = arith.constant dense<0.000000e+00> : vector<128x128xf32>
    %37 = tpu.matmul %34, %36, %cst_30 {dimension_numbers = #tpu.dot_dimension_numbers<[1], [0], [0], [1], [0, 0, 1, 1], [], []>} : vector<128x4xbf16>, vector<4x128xbf16>, vector<128x128xf32> -> vector<128x128xf32>
    %38 = arith.addf %32, %37 : vector<128x128xf32>
    %39 = vector.extract_strided_slice %7 {offsets = [1, 0, 0], sizes = [8, 16, 4], strides = [1, 1, 1]} : vector<10x16x4xbf16> to vector<8x16x4xbf16>
    %40 = vector.shape_cast %39 : vector<8x16x4xbf16> to vector<128x4xbf16>
    %c1_31 = arith.constant 1 : index
    %c2_32 = arith.constant 2 : index
    %c0_33 = arith.constant 0 : index
    %c0_34 = arith.constant 0 : index
    %41 = vector.load %arg4[%c1_31, %c2_32, %c0_33, %c0_34] : memref<3x3x4x128xbf16, #tpu.memory_space<vmem>>, vector<1x1x4x128xbf16>
    %42 = vector.shape_cast %41 : vector<1x1x4x128xbf16> to vector<4x128xbf16>
    %cst_35 = arith.constant dense<0.000000e+00> : vector<128x128xf32>
    %43 = tpu.matmul %40, %42, %cst_35 {dimension_numbers = #tpu.dot_dimension_numbers<[1], [0], [0], [1], [0, 0, 1, 1], [], []>} : vector<128x4xbf16>, vector<4x128xbf16>, vector<128x128xf32> -> vector<128x128xf32>
    %44 = arith.addf %38, %43 : vector<128x128xf32>
    %45 = vector.extract_strided_slice %5 {offsets = [2, 0, 0], sizes = [8, 16, 4], strides = [1, 1, 1]} : vector<10x16x4xbf16> to vector<8x16x4xbf16>
    %46 = vector.shape_cast %45 : vector<8x16x4xbf16> to vector<128x4xbf16>
    %c2_36 = arith.constant 2 : index
    %c0_37 = arith.constant 0 : index
    %c0_38 = arith.constant 0 : index
    %c0_39 = arith.constant 0 : index
    %47 = vector.load %arg4[%c2_36, %c0_37, %c0_38, %c0_39] : memref<3x3x4x128xbf16, #tpu.memory_space<vmem>>, vector<1x1x4x128xbf16>
    %48 = vector.shape_cast %47 : vector<1x1x4x128xbf16> to vector<4x128xbf16>
    %cst_40 = arith.constant dense<0.000000e+00> : vector<128x128xf32>
    %49 = tpu.matmul %46, %48, %cst_40 {dimension_numbers = #tpu.dot_dimension_numbers<[1], [0], [0], [1], [0, 0, 1, 1], [], []>} : vector<128x4xbf16>, vector<4x128xbf16>, vector<128x128xf32> -> vector<128x128xf32>
    %50 = arith.addf %44, %49 : vector<128x128xf32>
    %51 = vector.extract_strided_slice %6 {offsets = [2, 0, 0], sizes = [8, 16, 4], strides = [1, 1, 1]} : vector<10x16x4xbf16> to vector<8x16x4xbf16>
    %52 = vector.shape_cast %51 : vector<8x16x4xbf16> to vector<128x4xbf16>
    %c2_41 = arith.constant 2 : index
    %c1_42 = arith.constant 1 : index
    %c0_43 = arith.constant 0 : index
    %c0_44 = arith.constant 0 : index
    %53 = vector.load %arg4[%c2_41, %c1_42, %c0_43, %c0_44] : memref<3x3x4x128xbf16, #tpu.memory_space<vmem>>, vector<1x1x4x128xbf16>
    %54 = vector.shape_cast %53 : vector<1x1x4x128xbf16> to vector<4x128xbf16>
    %cst_45 = arith.constant dense<0.000000e+00> : vector<128x128xf32>
    %55 = tpu.matmul %52, %54, %cst_45 {dimension_numbers = #tpu.dot_dimension_numbers<[1], [0], [0], [1], [0, 0, 1, 1], [], []>} : vector<128x4xbf16>, vector<4x128xbf16>, vector<128x128xf32> -> vector<128x128xf32>
    %56 = arith.addf %50, %55 : vector<128x128xf32>
    %57 = vector.extract_strided_slice %7 {offsets = [2, 0, 0], sizes = [8, 16, 4], strides = [1, 1, 1]} : vector<10x16x4xbf16> to vector<8x16x4xbf16>
    %58 = vector.shape_cast %57 : vector<8x16x4xbf16> to vector<128x4xbf16>
    %c2_46 = arith.constant 2 : index
    %c2_47 = arith.constant 2 : index
    %c0_48 = arith.constant 0 : index
    %c0_49 = arith.constant 0 : index
    %59 = vector.load %arg4[%c2_46, %c2_47, %c0_48, %c0_49] : memref<3x3x4x128xbf16, #tpu.memory_space<vmem>>, vector<1x1x4x128xbf16>
    %60 = vector.shape_cast %59 : vector<1x1x4x128xbf16> to vector<4x128xbf16>
    %cst_50 = arith.constant dense<0.000000e+00> : vector<128x128xf32>
    %61 = tpu.matmul %58, %60, %cst_50 {dimension_numbers = #tpu.dot_dimension_numbers<[1], [0], [0], [1], [0, 0, 1, 1], [], []>} : vector<128x4xbf16>, vector<4x128xbf16>, vector<128x128xf32> -> vector<128x128xf32>
    %62 = arith.addf %56, %61 : vector<128x128xf32>
    %cst_51 = arith.constant dense<0.000000e+00> : vector<128xf32>
    %63 = vector.multi_reduction <add>, %62, %cst_51 [0] : vector<128x128xf32> to vector<128xf32>
    %64 = vector.shape_cast %63 : vector<128xf32> to vector<1x128xf32>
    %65 = arith.mulf %62, %62 : vector<128x128xf32>
    %cst_52 = arith.constant dense<0.000000e+00> : vector<128xf32>
    %66 = vector.multi_reduction <add>, %65, %cst_52 [0] : vector<128x128xf32> to vector<128xf32>
    %67 = vector.shape_cast %66 : vector<128xf32> to vector<1x128xf32>
    %68 = tpu.concatenate %64, %67 in 0 : vector<1x128xf32>, vector<1x128xf32> -> vector<2x128xf32>
    %c0_53 = arith.constant 0 : index
    %c0_54 = arith.constant 0 : index
    %c0_55 = arith.constant 0 : index
    %c0_56 = arith.constant 0 : index
    %69 = vector.load %arg6[%c0_53, %c0_54, %c0_55, %c0_56] : memref<1x1x2x128xf32, #tpu.memory_space<vmem>>, vector<1x1x2x128xf32>
    %70 = vector.shape_cast %69 : vector<1x1x2x128xf32> to vector<2x128xf32>
    %71 = vector.shape_cast %68 : vector<2x128xf32> to vector<1x1x2x128xf32>
    tpu.vector_store %arg6[%c0_53, %c0_54, %c0_55, %c0_56], %71 {strides = array<i32>} : memref<1x1x2x128xf32, #tpu.memory_space<vmem>>, vector<1x1x2x128xf32>,
    %72 = vector.shape_cast %62 : vector<128x128xf32> to vector<8x16x128xf32>
    %73 = arith.truncf %72 : vector<8x16x128xf32> to vector<8x16x128xbf16>
    %c0_57 = arith.constant 0 : index
    %c0_58 = arith.constant 0 : index
    %c0_59 = arith.constant 0 : index
    %c0_60 = arith.constant 0 : index
    %74 = vector.load %arg5[%c0_57, %c0_58, %c0_59, %c0_60] : memref<1x8x16x128xbf16, #tpu.memory_space<vmem>>, vector<1x8x16x128xbf16>
    %75 = vector.shape_cast %74 : vector<1x8x16x128xbf16> to vector<8x16x128xbf16>
    %76 = vector.shape_cast %73 : vector<8x16x128xbf16> to vector<1x8x16x128xbf16>
    tpu.vector_store %arg5[%c0_57, %c0_58, %c0_59, %c0_60], %76 {strides = array<i32>} : memref<1x8x16x128xbf16, #tpu.memory_space<vmem>>, vector<1x8x16x128xbf16>,
    return
  }
  func.func @transform_0(%arg0: i32, %arg1: i32) -> (i32, i32, i32, i32) {
    %c0_i32 = arith.constant 0 : i32
    %c0_i32_0 = arith.constant 0 : i32
    %c0_i32_1 = arith.constant 0 : i32
    return %arg0, %arg1, %c0_i32, %c0_i32_0 : i32, i32, i32, i32
  }
  func.func @transform_1(%arg0: i32, %arg1: i32) -> (i32, i32, i32, i32, i32) {
    %c0_i32 = arith.constant 0 : i32
    %c0_i32_0 = arith.constant 0 : i32
    %c0_i32_1 = arith.constant 0 : i32
    %c0_i32_2 = arith.constant 0 : i32
    return %arg0, %arg1, %c0_i32, %c0_i32_0, %c0_i32_1 : i32, i32, i32, i32, i32
  }
  func.func @transform_2(%arg0: i32, %arg1: i32) -> (i32, i32, i32, i32) {
    %c0_i32 = arith.constant 0 : i32
    %c0_i32_0 = arith.constant 0 : i32
    %c0_i32_1 = arith.constant 0 : i32
    %c0_i32_2 = arith.constant 0 : i32
    %c0_i32_3 = arith.constant 0 : i32
    return %c0_i32, %c0_i32_0, %c0_i32_1, %c0_i32_2 : i32, i32, i32, i32
  }
  func.func @transform_3(%arg0: i32, %arg1: i32) -> (i32, i32, i32, i32) {
    %c0_i32 = arith.constant 0 : i32
    %c0_i32_0 = arith.constant 0 : i32
    %c0_i32_1 = arith.constant 0 : i32
    return %arg0, %arg1, %c0_i32, %c0_i32_0 : i32, i32, i32, i32
  }
  func.func @transform_4(%arg0: i32, %arg1: i32) -> (i32, i32, i32, i32) {
    %c0_i32 = arith.constant 0 : i32
    %c0_i32_0 = arith.constant 0 : i32
    %c0_i32_1 = arith.constant 0 : i32
    return %arg0, %arg1, %c0_i32, %c0_i32_0 : i32, i32, i32, i32
  }
}

module attributes {stable_mosaic.version = 11 : i64} {
  func.func @_bn_lrelu_kernel(%arg0: i32, %arg1: i32, %arg2: memref<1x16x16x128xbf16, #tpu.memory_space<vmem>>, %arg3: memref<1x128xf32, #tpu.memory_space<vmem>>, %arg4: memref<1x128xf32, #tpu.memory_space<vmem>>, %arg5: memref<1x16x16x128xf32, #tpu.memory_space<vmem>>) attributes {dimension_semantics = [#tpu.dimension_semantics<parallel>, #tpu.dimension_semantics<parallel>], iteration_bounds = array<i64: 2, 1>, scalar_prefetch = 0 : i64, scratch_operands = 0 : i64, tpu.core_type = #tpu.core_type<tc>, window_params = [{transform_indices = @transform_0, window_bounds = array<i64: 1, 16, 16, 128>}, {pipeline_mode = #tpu.pipeline_mode<synchronous>, transform_indices = @transform_1, window_bounds = array<i64: 1, 128>}, {pipeline_mode = #tpu.pipeline_mode<synchronous>, transform_indices = @transform_2, window_bounds = array<i64: 1, 128>}, {transform_indices = @transform_3, window_bounds = array<i64: 1, 16, 16, 128>}]} {
    %c0 = arith.constant 0 : index
    %c0_0 = arith.constant 0 : index
    %c0_1 = arith.constant 0 : index
    %c0_2 = arith.constant 0 : index
    %0 = vector.load %arg2[%c0, %c0_0, %c0_1, %c0_2] : memref<1x16x16x128xbf16, #tpu.memory_space<vmem>>, vector<1x16x16x128xbf16>
    %1 = vector.shape_cast %0 : vector<1x16x16x128xbf16> to vector<16x16x128xbf16>
    %2 = arith.extf %1 : vector<16x16x128xbf16> to vector<16x16x128xf32>
    %c0_3 = arith.constant 0 : index
    %c0_4 = arith.constant 0 : index
    %3 = vector.load %arg3[%c0_3, %c0_4] : memref<1x128xf32, #tpu.memory_space<vmem>>, vector<1x128xf32>
    %4 = vector.shape_cast %3 : vector<1x128xf32> to vector<1x1x128xf32>
    %5 = vector.broadcast %4 : vector<1x1x128xf32> to vector<16x16x128xf32>
    %6 = arith.mulf %2, %5 : vector<16x16x128xf32>
    %c0_5 = arith.constant 0 : index
    %c0_6 = arith.constant 0 : index
    %7 = vector.load %arg4[%c0_5, %c0_6] : memref<1x128xf32, #tpu.memory_space<vmem>>, vector<1x128xf32>
    %8 = vector.shape_cast %7 : vector<1x128xf32> to vector<1x1x128xf32>
    %9 = vector.broadcast %8 : vector<1x1x128xf32> to vector<16x16x128xf32>
    %10 = arith.addf %6, %9 : vector<16x16x128xf32>
    %cst = arith.constant 0.000000e+00 : f32
    %11 = vector.broadcast %cst : f32 to vector<16x16x128xf32>
    %12 = arith.cmpf ogt, %10, %11 : vector<16x16x128xf32>
    %cst_7 = arith.constant 2.000000e-01 : f32
    %13 = vector.broadcast %cst_7 : f32 to vector<16x16x128xf32>
    %14 = arith.mulf %13, %10 : vector<16x16x128xf32>
    %15 = arith.select %12, %10, %14 : vector<16x16x128xi1>, vector<16x16x128xf32>
    %c0_8 = arith.constant 0 : index
    %c0_9 = arith.constant 0 : index
    %c0_10 = arith.constant 0 : index
    %c0_11 = arith.constant 0 : index
    %16 = vector.load %arg5[%c0_8, %c0_9, %c0_10, %c0_11] : memref<1x16x16x128xf32, #tpu.memory_space<vmem>>, vector<1x16x16x128xf32>
    %17 = vector.shape_cast %16 : vector<1x16x16x128xf32> to vector<16x16x128xf32>
    %18 = vector.shape_cast %15 : vector<16x16x128xf32> to vector<1x16x16x128xf32>
    tpu.vector_store %arg5[%c0_8, %c0_9, %c0_10, %c0_11], %18 {strides = array<i32>} : memref<1x16x16x128xf32, #tpu.memory_space<vmem>>, vector<1x16x16x128xf32>,
    return
  }
  func.func @transform_0(%arg0: i32, %arg1: i32) -> (i32, i32, i32, i32) {
    %c0_i32 = arith.constant 0 : i32
    %c0_i32_0 = arith.constant 0 : i32
    %c0_i32_1 = arith.constant 0 : i32
    return %arg0, %arg1, %c0_i32, %c0_i32_0 : i32, i32, i32, i32
  }
  func.func @transform_1(%arg0: i32, %arg1: i32) -> (i32, i32) {
    %c0_i32 = arith.constant 0 : i32
    %c0_i32_0 = arith.constant 0 : i32
    %c0_i32_1 = arith.constant 0 : i32
    return %c0_i32, %c0_i32_0 : i32, i32
  }
  func.func @transform_2(%arg0: i32, %arg1: i32) -> (i32, i32) {
    %c0_i32 = arith.constant 0 : i32
    %c0_i32_0 = arith.constant 0 : i32
    %c0_i32_1 = arith.constant 0 : i32
    return %c0_i32, %c0_i32_0 : i32, i32
  }
  func.func @transform_3(%arg0: i32, %arg1: i32) -> (i32, i32, i32, i32) {
    %c0_i32 = arith.constant 0 : i32
    %c0_i32_0 = arith.constant 0 : i32
    %c0_i32_1 = arith.constant 0 : i32
    return %arg0, %arg1, %c0_i32, %c0_i32_0 : i32, i32, i32, i32
  }
}

</mosaic_0001>

<bundles_post_ra>
// kernel: vgg_layer_forward.3
= control target key start
LH: loop header
LB: loop body
LE: loop exit
PB: predicated region body
PF: predicated region fallthrough
CT: control target
= control target key end

     0   :  { %s743_s12 = smov 0   ;;  %s745_s13 = smov 0   ;;  %s906_s0 = inlined_call_operand.vmem [shape: bf16[2,16,16,128], index: 0, kind: input, shape index: {}]   ;;  %s907_s1 = inlined_call_operand.vmem [shape: f32[1,128], index: 1, kind: input, shape index: {}]   ;;  %s908_s2 = inlined_call_operand.vmem [shape: f32[1,128], index: 2, kind: input, shape index: {}]   ;;  %s909_s3 = inlined_call_operand.vmem [shape: f32[2,16,16,128], index: 3, kind: output, shape index: {}]  }
   0x1   :  { %s747_s14 = smov 0  }
   0x2 LB: > { %s25_s15 = sadd.s32 1, %s717_s13  ;;  %p585_p0 = scmp.ge.s32.totalorder %s721_s14, 1  ;;  %s721_s14 = sphi %s747_s14, %s13_s14   ;;  %s717_s13 = sphi %s745_s13, %s911_s13   ;;  %s713_s12 = sphi %s743_s12, %s910_s12  }
   0x3   : > { %p27_p1 = scmp.ge.s32.totalorder %s25_s15, 2  ;;  %p159_p2 = scmp.lt.s32.totalorder %s721_s14, 3 }
   0x5   : > { %s913_s15 = smov (%p27_p1, %s25_s15), 0  ;;  %p160_p3 = pnand %p585_p0, %p159_p2 }
   0x6   : > { %p194_p4 = scmp.lt.s32.totalorder (!%p160_p3), %s713_s12, 1 }
   0x7   : > { %163 = sbr.rel (%p160_p3) target bundleno = 70 (0x46), region = 32 }
   0xc   : > { %s915_s12 = smov (!%p194_p4, %s713_s12), 1  ;;  %v772_v0 = vld [vmem:[%s907_s1] ss:$0 sm:$0xff] }
   0xd   : > { %s594_s16 = sshll.u32 %s915_s12, 7  ;;  %v781_v9 = vld [vmem:[%s908_s2] ss:$0 sm:$0xff]  ;;  %s595_s24 = sshll.u32 %s915_s12, 8 }
   0xe   : > { %s767_s19 = scalar_lea.vmem %s906_s0, %s594_s16  ;;  %s803_s27 = scalar_lea.vmem %s909_s3, %s595_s24 }
   0xf   : > { %v597_v1 = vld [vmem:[%s767_s19] sm:$0xff]   ;;  %v660_v2 = vld [vmem:[%s767_s19 + $0x8] sm:$0xff]   ;;  %v661_v3 = vld [vmem:[%s767_s19 + $0x10] sm:$0xff]  }
  0x10   : > { %v598_v4 = vunpack.c.l.bf16 %v597_v1  ;;  %v599_v5 = vunpack.c.h.bf16 %v597_v1  ;;  %v602_v6 = vunpack.c.l.bf16 %v660_v2  ;;  %v603_v7 = vunpack.c.h.bf16 %v660_v2  ;;  %v662_v8 = vld [vmem:[%s767_s19 + $0x18] sm:$0xff]   ;;  %v663_v37 = vld [vmem:[%s767_s19 + $0x20] sm:$0xff]   ;;  %v664_v41 = vld [vmem:[%s767_s19 + $0x28] sm:$0xff]  }
  0x11   : > { %v606_v10 = vunpack.c.l.bf16 %v661_v3  ;;  %v607_v11 = vunpack.c.h.bf16 %v661_v3  ;;  %v610_v12 = vunpack.c.l.bf16 %v662_v8  ;;  %v611_v13 = vunpack.c.h.bf16 %v662_v8  ;;  %v665_v42 = vld [vmem:[%s767_s19 + $0x30] sm:$0xff]   ;;  %v666_v49 = vld [vmem:[%s767_s19 + $0x38] sm:$0xff]  }
  0x12   : > { %v286_v14 = vmul.f32 %v598_v4, %v772_v0  ;;  %v287_v15 = vmul.f32 %v599_v5, %v772_v0  ;;  %v288_v16 = vmul.f32 %v602_v6, %v772_v0  ;;  %v289_v17 = vmul.f32 %v603_v7, %v772_v0  ;;  %v667_v7 = vld [vmem:[%s767_s19 + $0x40] sm:$0xff]  }
  0x13   : > { %v290_v18 = vmul.f32 %v606_v10, %v772_v0  ;;  %v291_v19 = vmul.f32 %v607_v11, %v772_v0  ;;  %v292_v20 = vmul.f32 %v610_v12, %v772_v0  ;;  %v293_v21 = vmul.f32 %v611_v13, %v772_v0 }
  0x14   : > { %v325_v22 = vadd.f32 %v781_v9, %v286_v14  ;;  %v326_v23 = vadd.f32 %v781_v9, %v287_v15  ;;  %v327_v24 = vadd.f32 %v781_v9, %v288_v16  ;;  %v328_v25 = vadd.f32 %v781_v9, %v289_v17 }
  0x15   : > { %v329_v26 = vadd.f32 %v781_v9, %v290_v18  ;;  %v330_v27 = vadd.f32 %v781_v9, %v291_v19  ;;  %v331_v28 = vadd.f32 %v781_v9, %v292_v20  ;;  %v332_v29 = vadd.f32 %v781_v9, %v293_v21  ;;  %v668_v20 = vld [vmem:[%s767_s19 + $0x48] sm:$0xff]  }
  0x16   : > { %vm357_vm0 = vcmp.gt.f32.partialorder %v325_v22, 0.0  ;;  %v389_v30 = vmul.f32 0.2, %v325_v22  ;;  %vm358_vm1 = vcmp.gt.f32.partialorder %v326_v23, 0.0  ;;  %v390_v31 = vmul.f32 0.2, %v326_v23 }
  0x17   : > { %vm359_vm2 = vcmp.gt.f32.partialorder %v327_v24, 0.0  ;;  %v391_v32 = vmul.f32 0.2, %v327_v24  ;;  %vm360_vm3 = vcmp.gt.f32.partialorder %v328_v25, 0.0  ;;  %v392_v33 = vmul.f32 0.2, %v328_v25 }
  0x18   : > { %v421_v34 = vsel %vm357_vm0, %v325_v22, %v389_v30  ;;  %v422_v35 = vsel %vm358_vm1, %v326_v23, %v390_v31  ;;  %vm361_vm4 = vcmp.gt.f32.partialorder %v329_v26, 0.0  ;;  %v393_v36 = vmul.f32 0.2, %v329_v26 }
  0x19   : > { %453 = vst [vmem:[%s803_s27] sm:$0xff] %v421_v34  ;;  %454 = vst [vmem:[%s803_s27 + $0x8] sm:$0xff] %v422_v35  ;;  %v423_v38 = vsel %vm359_vm2, %v327_v24, %v391_v32  ;;  %v424_v39 = vsel %vm360_vm3, %v328_v25, %v392_v33  ;;  %vm362_vm5 = vcmp.gt.f32.partialorder %v330_v27, 0.0  ;;  %v394_v40 = vmul.f32 0.2, %v330_v27  ;;  %v669_v25 = vld [vmem:[%s767_s19 + $0x50] sm:$0xff]  }
  0x1a   : > { %455 = vst [vmem:[%s803_s27 + $0x10] sm:$0xff] %v423_v38  ;;  %456 = vst [vmem:[%s803_s27 + $0x18] sm:$0xff] %v424_v39  ;;  %v425_v43 = vsel %vm361_vm4, %v329_v26, %v393_v36  ;;  %vm363_vm6 = vcmp.gt.f32.partialorder %v331_v28, 0.0  ;;  %v395_v44 = vmul.f32 0.2, %v331_v28  ;;  %vm364_vm7 = vcmp.gt.f32.partialorder %v332_v29, 0.0 }
  0x1b   : > { %457 = vst [vmem:[%s803_s27 + $0x20] sm:$0xff] %v425_v43  ;;  %v426_v45 = vsel %vm362_vm5, %v330_v27, %v394_v40  ;;  %v396_v46 = vmul.f32 0.2, %v332_v29  ;;  %v614_v47 = vunpack.c.l.bf16 %v663_v37  ;;  %v615_v48 = vunpack.c.h.bf16 %v663_v37  ;;  %v670_v43 = vld [vmem:[%s767_s19 + $0x58] sm:$0xff]  }
  0x1c   : > { %458 = vst [vmem:[%s803_s27 + $0x28] sm:$0xff] %v426_v45  ;;  %v427_v50 = vsel %vm363_vm6, %v331_v28, %v395_v44  ;;  %v618_v51 = vunpack.c.l.bf16 %v664_v41  ;;  %v619_v52 = vunpack.c.h.bf16 %v664_v41  ;;  %v622_v53 = vunpack.c.l.bf16 %v665_v42 }
  0x1d   : > { %459 = vst [vmem:[%s803_s27 + $0x30] sm:$0xff] %v427_v50  ;;  %v428_v54 = vsel %vm364_vm7, %v332_v29, %v396_v46  ;;  %v294_v55 = vmul.f32 %v614_v47, %v772_v0  ;;  %v295_v56 = vmul.f32 %v615_v48, %v772_v0  ;;  %v623_v57 = vunpack.c.h.bf16 %v665_v42 }
  0x1e   : > { %460 = vst [vmem:[%s803_s27 + $0x38] sm:$0xff] %v428_v54  ;;  %v296_v58 = vmul.f32 %v618_v51, %v772_v0  ;;  %v297_v59 = vmul.f32 %v619_v52, %v772_v0  ;;  %v298_v60 = vmul.f32 %v622_v53, %v772_v0  ;;  %v626_v61 = vunpack.c.l.bf16 %v666_v49  ;;  %v671_v54 = vld [vmem:[%s767_s19 + $0x60] sm:$0xff]  }
  0x1f   : > { %v333_v62 = vadd.f32 %v781_v9, %v294_v55  ;;  %v334_v63 = vadd.f32 %v781_v9, %v295_v56  ;;  %v299_v1 = vmul.f32 %v623_v57, %v772_v0  ;;  %v627_v2 = vunpack.c.h.bf16 %v666_v49 }
  0x20   : > { %v335_v3 = vadd.f32 %v781_v9, %v296_v58  ;;  %v336_v4 = vadd.f32 %v781_v9, %v297_v59  ;;  %v337_v5 = vadd.f32 %v781_v9, %v298_v60  ;;  %v300_v6 = vmul.f32 %v626_v61, %v772_v0 }
  0x21   : > { %vm365_vm8 = vcmp.gt.f32.partialorder %v333_v62, 0.0  ;;  %v397_v8 = vmul.f32 0.2, %v333_v62  ;;  %vm366_vm9 = vcmp.gt.f32.partialorder %v334_v63, 0.0  ;;  %v398_v10 = vmul.f32 0.2, %v334_v63 }
  0x22   : > { %vm367_vm10 = vcmp.gt.f32.partialorder %v335_v3, 0.0  ;;  %v399_v11 = vmul.f32 0.2, %v335_v3  ;;  %vm368_vm11 = vcmp.gt.f32.partialorder %v336_v4, 0.0  ;;  %v400_v12 = vmul.f32 0.2, %v336_v4 }
  0x23   : > { %v429_v13 = vsel %vm365_vm8, %v333_v62, %v397_v8  ;;  %v430_v14 = vsel %vm366_vm9, %v334_v63, %v398_v10  ;;  %vm369_vm12 = vcmp.gt.f32.partialorder %v337_v5, 0.0  ;;  %v401_v15 = vmul.f32 0.2, %v337_v5 }
  0x24   : > { %461 = vst [vmem:[%s803_s27 + $0x40] sm:$0xff] %v429_v13  ;;  %462 = vst [vmem:[%s803_s27 + $0x48] sm:$0xff] %v430_v14  ;;  %v431_v16 = vsel %vm367_vm10, %v335_v3, %v399_v11  ;;  %v432_v17 = vsel %vm368_vm11, %v336_v4, %v400_v12  ;;  %v338_v18 = vadd.f32 %v781_v9, %v299_v1  ;;  %v630_v23 = vunpack.c.l.bf16 %v667_v7  ;;  %v672_v1 = vld [vmem:[%s767_s19 + $0x68] sm:$0xff]  }
  0x25   : > { %v339_v19 = vadd.f32 %v781_v9, %v300_v6  ;;  %463 = vst [vmem:[%s803_s27 + $0x50] sm:$0xff] %v431_v16  ;;  %464 = vst [vmem:[%s803_s27 + $0x58] sm:$0xff] %v432_v17  ;;  %v433_v21 = vsel %vm369_vm12, %v337_v5, %v401_v15  ;;  %v301_v22 = vmul.f32 %v627_v2, %v772_v0  ;;  %v631_v24 = vunpack.c.h.bf16 %v667_v7  ;;  %v673_v2 = vld [vmem:[%s767_s19 + $0x70] sm:$0xff]  }
  0x26   : > { %465 = vst [vmem:[%s803_s27 + $0x60] sm:$0xff] %v433_v21  ;;  %vm370_vm13 = vcmp.gt.f32.partialorder %v338_v18, 0.0  ;;  %v402_v26 = vmul.f32 0.2, %v338_v18  ;;  %v302_v29 = vmul.f32 %v630_v23, %v772_v0  ;;  %v634_v31 = vunpack.c.l.bf16 %v668_v20  ;;  %v674_v21 = vld [vmem:[%s767_s19 + $0x78] sm:$0xff]  }
  0x27   : > { %vm371_vm14 = vcmp.gt.f32.partialorder %v339_v19, 0.0  ;;  %v403_v27 = vmul.f32 0.2, %v339_v19  ;;  %v340_v28 = vadd.f32 %v781_v9, %v301_v22  ;;  %v303_v30 = vmul.f32 %v631_v24, %v772_v0 }
  0x28   : > { %v434_v32 = vsel %vm370_vm13, %v338_v18, %v402_v26  ;;  %v635_v34 = vunpack.c.h.bf16 %v668_v20  ;;  %v638_v35 = vunpack.c.l.bf16 %v669_v25  ;;  %v341_v37 = vadd.f32 %v781_v9, %v302_v29 }
  0x29   : > { %v435_v33 = vsel %vm371_vm14, %v339_v19, %v403_v27  ;;  %466 = vst [vmem:[%s803_s27 + $0x68] sm:$0xff] %v434_v32  ;;  %vm372_vm15 = vcmp.gt.f32.partialorder %v340_v28, 0.0  ;;  %v404_v36 = vmul.f32 0.2, %v340_v28  ;;  %v342_v38 = vadd.f32 %v781_v9, %v303_v30 }
  0x2a   : > { %467 = vst [vmem:[%s803_s27 + $0x70] sm:$0xff] %v435_v33  ;;  %v304_v39 = vmul.f32 %v634_v31, %v772_v0  ;;  %v305_v40 = vmul.f32 %v635_v34, %v772_v0  ;;  %v306_v41 = vmul.f32 %v638_v35, %v772_v0  ;;  %v639_v42 = vunpack.c.h.bf16 %v669_v25 }
  0x2b   : > { %v436_v44 = vsel %vm372_vm15, %v340_v28, %v404_v36  ;;  %vm373_vm0 = vcmp.gt.f32.partialorder %v341_v37, 0.0  ;;  %v405_v45 = vmul.f32 0.2, %v341_v37  ;;  %vm374_vm1 = vcmp.gt.f32.partialorder %v342_v38, 0.0 }
  0x2c   : > { %468 = vst [vmem:[%s803_s27 + $0x78] sm:$0xff] %v436_v44  ;;  %v406_v46 = vmul.f32 0.2, %v342_v38  ;;  %v343_v47 = vadd.f32 %v781_v9, %v304_v39  ;;  %v344_v48 = vadd.f32 %v781_v9, %v305_v40  ;;  %v345_v49 = vadd.f32 %v781_v9, %v306_v41 }
  0x2d   : > { %v437_v50 = vsel %vm373_vm0, %v341_v37, %v405_v45  ;;  %v307_v51 = vmul.f32 %v639_v42, %v772_v0  ;;  %v642_v52 = vunpack.c.l.bf16 %v670_v43  ;;  %v643_v53 = vunpack.c.h.bf16 %v670_v43 }
  0x2e   : > { %469 = vst [vmem:[%s803_s27 + $0x80] sm:$0xff] %v437_v50  ;;  %v438_v55 = vsel %vm374_vm1, %v342_v38, %v406_v46  ;;  %vm375_vm2 = vcmp.gt.f32.partialorder %v343_v47, 0.0  ;;  %v407_v56 = vmul.f32 0.2, %v343_v47  ;;  %vm376_vm3 = vcmp.gt.f32.partialorder %v344_v48, 0.0 }
  0x2f   : > { %470 = vst [vmem:[%s803_s27 + $0x88] sm:$0xff] %v438_v55  ;;  %v408_v57 = vmul.f32 0.2, %v344_v48  ;;  %vm377_vm4 = vcmp.gt.f32.partialorder %v345_v49, 0.0  ;;  %v409_v58 = vmul.f32 0.2, %v345_v49  ;;  %v346_v59 = vadd.f32 %v781_v9, %v307_v51 }
  0x30   : > { %v439_v60 = vsel %vm375_vm2, %v343_v47, %v407_v56  ;;  %v308_v61 = vmul.f32 %v642_v52, %v772_v0  ;;  %v309_v62 = vmul.f32 %v643_v53, %v772_v0  ;;  %v646_v63 = vunpack.c.l.bf16 %v671_v54 }
  0x31   : > { %471 = vst [vmem:[%s803_s27 + $0x90] sm:$0xff] %v439_v60  ;;  %v440_v3 = vsel %vm376_vm3, %v344_v48, %v408_v57  ;;  %v441_v4 = vsel %vm377_vm4, %v345_v49, %v409_v58  ;;  %vm378_vm5 = vcmp.gt.f32.partialorder %v346_v59, 0.0  ;;  %v410_v5 = vmul.f32 0.2, %v346_v59 }
  0x32   : > { %472 = vst [vmem:[%s803_s27 + $0x98] sm:$0xff] %v440_v3  ;;  %473 = vst [vmem:[%s803_s27 + $0xa0] sm:$0xff] %v441_v4  ;;  %v347_v6 = vadd.f32 %v781_v9, %v308_v61  ;;  %v348_v7 = vadd.f32 %v781_v9, %v309_v62  ;;  %v310_v8 = vmul.f32 %v646_v63, %v772_v0  ;;  %v647_v10 = vunpack.c.h.bf16 %v671_v54 }
  0x33   : > { %v442_v11 = vsel %vm378_vm5, %v346_v59, %v410_v5  ;;  %v650_v12 = vunpack.c.l.bf16 %v672_v1  ;;  %v651_v13 = vunpack.c.h.bf16 %v672_v1  ;;  %v654_v14 = vunpack.c.l.bf16 %v673_v2 }
  0x34   : > { %474 = vst [vmem:[%s803_s27 + $0xa8] sm:$0xff] %v442_v11  ;;  %vm379_vm6 = vcmp.gt.f32.partialorder %v347_v6, 0.0  ;;  %v411_v15 = vmul.f32 0.2, %v347_v6  ;;  %vm380_vm7 = vcmp.gt.f32.partialorder %v348_v7, 0.0  ;;  %v349_v17 = vadd.f32 %v781_v9, %v310_v8 }
  0x35   : > { %v412_v16 = vmul.f32 0.2, %v348_v7  ;;  %v311_v18 = vmul.f32 %v647_v10, %v772_v0  ;;  %v312_v19 = vmul.f32 %v650_v12, %v772_v0  ;;  %v313_v20 = vmul.f32 %v651_v13, %v772_v0 }
  0x36   : > { %v443_v22 = vsel %vm379_vm6, %v347_v6, %v411_v15  ;;  %v314_v24 = vmul.f32 %v654_v14, %v772_v0  ;;  %v655_v25 = vunpack.c.h.bf16 %v673_v2  ;;  %vm381_vm8 = vcmp.gt.f32.partialorder %v349_v17, 0.0 }
  0x37   : > { %v444_v23 = vsel %vm380_vm7, %v348_v7, %v412_v16  ;;  %475 = vst [vmem:[%s803_s27 + $0xb0] sm:$0xff] %v443_v22  ;;  %v413_v26 = vmul.f32 0.2, %v349_v17  ;;  %v350_v27 = vadd.f32 %v781_v9, %v311_v18  ;;  %v351_v28 = vadd.f32 %v781_v9, %v312_v19 }
  0x38   : > { %476 = vst [vmem:[%s803_s27 + $0xb8] sm:$0xff] %v444_v23  ;;  %v352_v29 = vadd.f32 %v781_v9, %v313_v20  ;;  %v353_v30 = vadd.f32 %v781_v9, %v314_v24  ;;  %v315_v31 = vmul.f32 %v655_v25, %v772_v0  ;;  %v658_v32 = vunpack.c.l.bf16 %v674_v21 }
  0x39   : > { %v445_v33 = vsel %vm381_vm8, %v349_v17, %v413_v26  ;;  %vm382_vm9 = vcmp.gt.f32.partialorder %v350_v27, 0.0  ;;  %v414_v34 = vmul.f32 0.2, %v350_v27  ;;  %vm383_vm10 = vcmp.gt.f32.partialorder %v351_v28, 0.0 }
  0x3a   : > { %477 = vst [vmem:[%s803_s27 + $0xc0] sm:$0xff] %v445_v33  ;;  %v415_v35 = vmul.f32 0.2, %v351_v28  ;;  %vm384_vm11 = vcmp.gt.f32.partialorder %v352_v29, 0.0  ;;  %v416_v36 = vmul.f32 0.2, %v352_v29  ;;  %v354_v39 = vadd.f32 %v781_v9, %v315_v31 }
  0x3b   : > { %vm385_vm12 = vcmp.gt.f32.partialorder %v353_v30, 0.0  ;;  %v446_v37 = vsel %vm382_vm9, %v350_v27, %v414_v34  ;;  %v417_v38 = vmul.f32 0.2, %v353_v30  ;;  %v316_v40 = vmul.f32 %v658_v32, %v772_v0 }
  0x3c   : > { %478 = vst [vmem:[%s803_s27 + $0xc8] sm:$0xff] %v446_v37  ;;  %v447_v41 = vsel %vm383_vm10, %v351_v28, %v415_v35  ;;  %v448_v42 = vsel %vm384_vm11, %v352_v29, %v416_v36  ;;  %v659_v43 = vunpack.c.h.bf16 %v674_v21  ;;  %vm386_vm13 = vcmp.gt.f32.partialorder %v354_v39, 0.0 }
  0x3d   : > { %479 = vst [vmem:[%s803_s27 + $0xd0] sm:$0xff] %v447_v41  ;;  %480 = vst [vmem:[%s803_s27 + $0xd8] sm:$0xff] %v448_v42  ;;  %v449_v44 = vsel %vm385_vm12, %v353_v30, %v417_v38  ;;  %v418_v45 = vmul.f32 0.2, %v354_v39  ;;  %v355_v46 = vadd.f32 %v781_v9, %v316_v40 }
  0x3e   : > { %481 = vst [vmem:[%s803_s27 + $0xe0] sm:$0xff] %v449_v44  ;;  %v317_v47 = vmul.f32 %v659_v43, %v772_v0 }
  0x3f   : > { %v450_v48 = vsel %vm386_vm13, %v354_v39, %v418_v45  ;;  %vm387_vm14 = vcmp.gt.f32.partialorder %v355_v46, 0.0  ;;  %v419_v49 = vmul.f32 0.2, %v355_v46 }
  0x40   : > { %482 = vst [vmem:[%s803_s27 + $0xe8] sm:$0xff] %v450_v48  ;;  %v356_v50 = vadd.f32 %v781_v9, %v317_v47 }
  0x41   : > { %v451_v51 = vsel %vm387_vm14, %v355_v46, %v419_v49 }
  0x42   : > { %483 = vst [vmem:[%s803_s27 + $0xf0] sm:$0xff] %v451_v51  ;;  %vm388_vm15 = vcmp.gt.f32.partialorder %v356_v50, 0.0  ;;  %v420_v52 = vmul.f32 0.2, %v356_v50 }
  0x44   : > { %v452_v53 = vsel %vm388_vm15, %v356_v50, %v420_v52 }
  0x45   : > { %484 = vst [vmem:[%s803_s27 + $0xf8] sm:$0xff] %v452_v53 }
  0x46 PF: > { %s13_s14 = sadd.s32 1, %s721_s14   ;;  %s910_s12 = smov %s717_s13 }
  0x47   : > { %p10_p5 = scmp.ge.s32.totalorder %s13_s14, 4   ;;  %s911_s13 = smov %s913_s15 }
  0x49   :  { %12 = sbr.rel (!%p10_p5) target bundleno = 2 (0x2), region = 62 }

// kernel: vgg_layer_forward.2
= control target key start
LH: loop header
LB: loop body
LE: loop exit
PB: predicated region body
PF: predicated region fallthrough
CT: control target
= control target key end

     0   :  { %s2807_s15 = smov 0   ;;  %s2809_s16 = smov 0   ;;  %s3645_s0 = inlined_call_operand.vmem [shape: bf16[2,18,18,4], index: 0, kind: input, shape index: {}]   ;;  %s3646_s1 = inlined_call_operand.vmem [shape: bf16[2,2,2,18,4], index: 1, kind: input, shape index: {}]   ;;  %s3647_s2 = inlined_call_operand.vmem [shape: bf16[3,3,4,128], index: 2, kind: input, shape index: {}]   ;;  %s3648_s3 = inlined_call_operand.vmem [shape: bf16[2,16,16,128], index: 3, kind: output, shape index: {0}]   ;;  %s3649_s4 = inlined_call_operand.vmem [shape: f32[2,2,2,128], index: 4, kind: output, shape index: {1}]  }
   0x1   :  { %s2811_s17 = smov 0   ;;  %s2813_s18 = smov 0  }
   0x2   :  { %s2815_s19 = smov 0  }
   0x3 LB: > { %s24_s20 = sadd.s32 1, %s2772_s17  ;;  %s27_s21 = sadd.s32 1, %s2776_s18  ;;  %s2780_s19 = sphi %s2815_s19, %s15_s19   ;;  %s2776_s18 = sphi %s2813_s18, %s3701_s18   ;;  %s2772_s17 = sphi %s2811_s17, %s3700_s17   ;;  %s2768_s16 = sphi %s2809_s16, %s3699_s16   ;;  %s2764_s15 = sphi %s2807_s15, %s3698_s15  }
   0x4   : > { %p25_p0 = scmp.ge.s32.totalorder %s24_s20, 2  ;;  %p2222_p1 = scmp.ge.s32.totalorder %s2780_s19, 1 }
   0x5   : > { %p215_p2 = scmp.lt.s32.totalorder %s2780_s19, 5 }
   0x6   : > { %s3703_s20 = smov (%p25_p0, %s24_s20), 0  ;;  %s3705_s21 = smov (!%p25_p0, %s27_s21), %s2776_s18 }
   0x7   : > { %p216_p3 = pnand %p2222_p1, %p215_p2  ;;  %p29_p4 = scmp.ge.s32.totalorder %s3705_s21, 2 }
   0x9   : > { %s3707_s21 = smov (%p29_p4, %s3705_s21), 0  ;;  %219 = sbr.rel (%p216_p3) target bundleno = 418 (0x1a2), region = 32 }
   0xe   : > { %v2232_v0 = vld [vmem:[%s3647_s2 + $0x2] sm:$0x3]  ;;  %vm600_vm0 = vcmask 1041408   ;;  %s2843_s24 = sshll.u32 %s2764_s15, 3  ;;  %p279_p5 = scmp.lt.s32.totalorder %s2768_s16, 1  ;;  %vm575_vm3 = vcmask 31744  }
   0xf   : > { %2679 = vmatprep.subr.msk.bf16.mxu1 %vm600_vm0, %v2232_v0  ;;  %2678 = vmatprep.subr.msk.bf16.mxu0 %vm600_vm0, %v2232_v0  ;;  %v602_v1 = vsel %vm600_vm0, %v2232_v0, 0  ;;  %p281_p6 = scmp.lt.s32.totalorder %s2843_s24, 17  ;;  %v353_v2 = vld [vmem:[%s3647_s2] sm:$0x3]  ;;  %v2273_v3 = vld [vmem:[%s3647_s2 + $0x4] sm:$0x3] }
  0x10   : > { %2677 = vmatpush3.bf16.msra.mxu1 %v602_v1  ;;  %2515 = vmatpush3.bf16.msra.mxu0 %v602_v1  ;;  %s3709_s16 = smov (!%p279_p5, %s2768_s16), 1  ;;  %vm354_vm1 = vsmask.f32 3328  ;;  %vm355_vm2 = vsmask.f32 7440  ;;  %v2890_v15 = vsel %vm600_vm0, %v353_v2, 0 }
  0x11   : > { %s282_s29 = scalar_select %p281_p6, %s2843_s24, 17  ;;  %2680 = vmatprep.subr.msk.bf16.mxu1 %vm600_vm0, %v353_v2  ;;  %2681 = vmatprep.subr.msk.bf16.mxu0 %vm600_vm0, %v2273_v3  ;;  %vm2905_vm4 = vmor %vm354_vm1, %vm355_vm2  ;;  %v2910_v34 = vsel %vm600_vm0, %v2273_v3, 0  ;;  %vm873_vm5 = vcmask 1042432   ;;  %vm874_vm6 = vcmask 1046532   ;;  %vm1968_vm8 = vcmask 1040384  }
  0x12   : > { %s2689_s30 = smul.u32 54, %s3709_s16  ;;  %vm3053_vm7 = vmor %vm873_vm5, %vm874_vm6  ;;  %p296_p7 = scmp.lt.s32.totalorder %s2764_s15, 1 }
  0x13   : > { %s2688_s5 = smul.u32 3, %s282_s29  ;;  %p306_p8 = scmp.lt.s32.totalorder %s2843_s24, 15 }
  0x14   : > { %s3711_s15 = smov (!%p296_p7, %s2764_s15), 1  ;;  %s2691_s22 = smul.u32 12, %s3709_s16 }
  0x15   : > { %s285_s6 = sadd.s32 %s2689_s30, %s2688_s5  ;;  %s2690_s23 = smul.u32 6, %s3711_s15 }
  0x16   : > { %s2224_s7 = sshll.u32 %s285_s6, 2  ;;  %s3713_s24 = smov (!%p306_p8, %s2843_s24), 15 }
  0x17   : > { %s2864_s10 = scalar_lea.vmem %s3645_s0, %s2224_s7  ;;  %s300_s27 = sadd.s32 %s2691_s22, %s2690_s23 }
  0x18   : > { %v2867_v4 = vld [vmem:[%s2864_s10] sm:$0xf]  ;;  %v2870_v5 = vld [vmem:[%s2864_s10 + $0x4] sm:$0xf]  ;;  %v2873_v6 = vld [vmem:[%s2864_s10 + $0x8] sm:$0x1] }
  0x19   : > { %v358_v7 = vshrl.u32 %v2867_v4, 16  ;;  %v361_v8 = vshll.u32 %v2867_v4, 16  ;;  %v367_v9 = vshll.u32 %v2870_v5, 16  ;;  %v371_v10 = vshrl.u32 %v2870_v5, 16  ;;  %v2880_v11 = vld [vmem:[%s2864_s10 + $0x30] sm:$0xf] }
  0x1a   : > { %v377_v12 = vshll.u32 %v2873_v6, 16  ;;  %v2884_v13 = vld [vmem:[%s2864_s10 + $0x34] sm:$0xf]  ;;  %v2887_v14 = vld [vmem:[%s2864_s10 + $0x38] sm:$0x1]  ;;  %v454_v21 = vshrl.u32 %v2880_v11, 16 }
  0x1b   : > { %v360_v16 = vrot.slane %v358_v7, 4  ;;  %v363_v17 = vrot.slane %v361_v8, 5  ;;  %v369_v18 = vrot.slane %v367_v9, 5  ;;  %v373_v19 = vrot.slane %v371_v10, 4  ;;  %v2898_v28 = vld [vmem:[%s2864_s10 + $0xc] sm:$0xf] }
  0x1c   : > { %v379_v20 = vrot.slane %v377_v12, 5  ;;  %v457_v22 = vshll.u32 %v2880_v11, 16  ;;  %v463_v23 = vshll.u32 %v2884_v13, 16  ;;  %v467_v26 = vshrl.u32 %v2884_v13, 16  ;;  %v2901_v29 = vld [vmem:[%s2864_s10 + $0x10] sm:$0xf] }
  0x1d   : > { %v364_v24 = vor.u32 %v363_v17, %v360_v16  ;;  %v374_v25 = vor.u32 %v373_v19, %v369_v18  ;;  %v473_v27 = vshll.u32 %v2887_v14, 16  ;;  %v456_v31 = vrot.slane %v454_v21, 4  ;;  %v2913_v40 = vld [vmem:[%s2864_s10 + $0x14] sm:$0x1]  ;;  %v2924_v52 = vld [vmem:[%s2864_s10 + $0x3c] sm:$0xf] }
  0x1e   : > { %v459_v32 = vrot.slane %v457_v22, 5  ;;  %v465_v33 = vrot.slane %v463_v23, 5  ;;  %v469_v37 = vrot.slane %v467_v26, 4  ;;  %v382_v41 = vshrl.u32 %v2898_v28, 16  ;;  %v2928_v57 = vld [vmem:[%s2864_s10 + $0x40] sm:$0xf] }
  0x1f   : > { %v365_v35 = vrot.slane %v364_v24, 4  ;;  %v375_v36 = vrot.slane %v374_v25, 4  ;;  %v475_v38 = vrot.slane %v473_v27, 5  ;;  %v385_v42 = vshll.u32 %v2898_v28, 16  ;;  %v2936_v62 = vld [vmem:[%s2864_s10 + $0x44] sm:$0x1] }
  0x20   : > { %v460_v39 = vor.u32 %v459_v32, %v456_v31  ;;  %v391_v43 = vshll.u32 %v2901_v29, 16  ;;  %v470_v46 = vor.u32 %v469_v37, %v465_v33  ;;  %v395_v47 = vshrl.u32 %v2901_v29, 16  ;;  %v2942_v3 = vld [vmem:[%s2864_s10 + $0x18] sm:$0xf]  ;;  %v2951_v19 = vld [vmem:[%s2864_s10 + $0x1c] sm:$0xf] }
  0x21   : > { %v370_v44 = vsel %vm2905_vm4, %v365_v35, %v369_v18  ;;  %v380_v45 = vsel %vm2905_vm4, %v375_v36, %v379_v20  ;;  %v384_v50 = vrot.slane %v382_v41, 4  ;;  %v387_v51 = vrot.slane %v385_v42, 5  ;;  %v2958_v23 = vld [vmem:[%s2864_s10 + $0x20] sm:$0x1]  ;;  %v2965_v32 = vld [vmem:[%s2864_s10 + $0x48] sm:$0xf] }
  0x22   : > { %v2233_v48 = vcombine.low %v370_v44, %v380_v45  ;;  %v461_v49 = vrot.slane %v460_v39, 4  ;;  %v471_v53 = vrot.slane %v470_v46, 4  ;;  %v393_v54 = vrot.slane %v391_v43, 5  ;;  %v2978_v44 = vld [vmem:[%s2864_s10 + $0x4c] sm:$0xf]  ;;  %s2225_s30 = sshll.u32 %s300_s27, 2 }
  0x23   : > { %v397_v55 = vrot.slane %v395_v47, 4  ;;  %v401_v56 = vshll.u32 %v2913_v40, 16  ;;  %v881_v58 = vrot.slane %v2873_v6, 5  ;;  %v388_v60 = vor.u32 %v387_v51, %v384_v50  ;;  %s3177_s7 = scalar_lea.vmem %s3646_s1, %s2225_s30  ;;  %s2227_s12 = sshll.u32 %s3713_s24, 1 }
  0x24   : > { %2516 = vmatprep.mubr.msk.bf16.mxu0 %vm575_vm3, %v2233_v48  ;;  %v466_v59 = vsel %vm2905_vm4, %v461_v49, %v465_v33  ;;  %v885_v61 = vrot.slane %v2901_v29, 5  ;;  %v476_v63 = vsel %vm2905_vm4, %v471_v53, %v475_v38  ;;  %v478_v2 = vshrl.u32 %v2924_v52, 16  ;;  %v2973_v38 = vld [vmem:[%s3647_s2 + $0x8] sm:$0x3]  ;;  %s2228_s13 = sshll.u32 %s3709_s16, 5  ;;  %s2230_s26 = sshll.u32 %s3709_s16, 1 }
  0x25   : > { %v398_v0 = vor.u32 %v397_v55, %v393_v54  ;;  %v403_v1 = vrot.slane %v401_v56, 5  ;;  %v2944_v7 = vcombine.low %v466_v59, %v476_v63  ;;  %v389_v8 = vrot.slane %v388_v60, 4  ;;  %v2992_v63 = vld [vmem:[%s2864_s10 + $0x24] sm:$0xf]  ;;  %s3562_s24 = sadd.s32 %s2228_s13, %s2227_s12  ;;  %s319_s27 = sadd.s32 %s2230_s26, %s3711_s15 }
  0x26   : > { %v481_v9 = vshll.u32 %v2924_v52, 16  ;;  %v487_v10 = vshll.u32 %v2928_v57, 16  ;;  %v480_v16 = vrot.slane %v478_v2, 4  ;;  %v491_v17 = vshrl.u32 %v2928_v57, 16  ;;  %s2229_s14 = sshll.u32 %s3562_s24, 2  ;;  %s2231_s28 = sshll.u32 %s319_s27, 1 }
  0x27   : > { %v399_v12 = vrot.slane %v398_v0, 4  ;;  %v497_v18 = vshll.u32 %v2936_v62, 16  ;;  %2524 = vmatprep.mubr.msk.bf16.mxu1 %vm575_vm3, %v2944_v7  ;;  %v394_v20 = vsel %vm2905_vm4, %v389_v8, %v393_v54  ;;  %v406_v24 = vshrl.u32 %v2942_v3, 16  ;;  %v2986_v54 = vld [vmem:[%s2864_s10 + $0x50] sm:$0x1]  ;;  %s3584_s25 = scalar_lea.vmem %s3648_s3, %s2229_s14  ;;  %s321_s5 = scalar_lea.vmem %s3649_s4, %s2231_s28 }
  0x28   : > { %v483_v21 = vrot.slane %v481_v9, 5  ;;  %v489_v22 = vrot.slane %v487_v10, 5  ;;  %v493_v26 = vrot.slane %v491_v17, 4  ;;  %v409_v31 = vshll.u32 %v2942_v3, 16  ;;  %v3000_v8 = vld [vmem:[%s2864_s10 + $0x28] sm:$0xf] }
  0x29   : > { %v404_v25 = vsel %vm2905_vm4, %v399_v12, %v403_v1  ;;  %v499_v27 = vrot.slane %v497_v18, 5  ;;  %v408_v36 = vrot.slane %v406_v24, 4  ;;  %v415_v37 = vshll.u32 %v2951_v19, 16  ;;  %v3008_v17 = vld [vmem:[%s3647_s2 + $0x6] sm:$0x3] }
  0x2a   : > { %v2967_v33 = vcombine.low %v394_v20, %v404_v25  ;;  %v484_v35 = vor.u32 %v483_v21, %v480_v16  ;;  %v494_v39 = vor.u32 %v493_v26, %v489_v22  ;;  %v411_v41 = vrot.slane %v409_v31, 5 }
  0x2b   : > { %v419_v42 = vshrl.u32 %v2951_v19, 16  ;;  %v425_v43 = vshll.u32 %v2958_v23, 16  ;;  %v417_v46 = vrot.slane %v415_v37, 5  ;;  %v502_v47 = vshrl.u32 %v2965_v32, 16 }
  0x2c   : > { %2517 = vmatmul.mubr.msk.bf16.vlgmr.msra.gmra.mxu0 %vm575_vm3, %v2967_v33  ;;  %v485_v45 = vrot.slane %v484_v35, 4  ;;  %v505_v48 = vshll.u32 %v2965_v32, 16  ;;  %v495_v49 = vrot.slane %v494_v39, 4  ;;  %v412_v50 = vor.u32 %v411_v41, %v408_v36  ;;  %v3021_v35 = vld [vmem:[%s2864_s10 + $0x54] sm:$0xf] }
  0x2d   : > { %2551 = vmatpush3.bf16.msra.mxu0 %v2910_v34  ;;  %v421_v51 = vrot.slane %v419_v42, 4  ;;  %v427_v53 = vrot.slane %v425_v43, 5  ;;  %v504_v56 = vrot.slane %v502_v47, 4  ;;  %v511_v60 = vshll.u32 %v2978_v44, 16  ;;  %v3028_v42 = vld [vmem:[%s2864_s10 + $0x58] sm:$0xf] }
  0x2e   : > { %v490_v55 = vsel %vm2905_vm4, %v485_v45, %v489_v22  ;;  %v507_v59 = vrot.slane %v505_v48, 5  ;;  %2683 = vmatprep.subr.msk.bf16.mxu0 %vm600_vm0, %v2973_v38  ;;  %v500_v34 = vsel %vm2905_vm4, %v495_v49, %v499_v27  ;;  %v413_v0 = vrot.slane %v412_v50, 4  ;;  %v3013_v22 = vld [vmem:[%s2864_s10 + $0x2c] sm:$0x1] }
  0x2f   : > { %v422_v1 = vor.u32 %v421_v51, %v417_v46  ;;  %v515_v2 = vshrl.u32 %v2978_v44, 16  ;;  %v3002_v9 = vcombine.low %v490_v55, %v500_v34  ;;  %v513_v12 = vrot.slane %v511_v60, 5 }
  0x30   : > { %v508_v10 = vor.u32 %v507_v59, %v504_v56  ;;  %v521_v16 = vshll.u32 %v2986_v54, 16  ;;  %v418_v18 = vsel %vm2905_vm4, %v413_v0, %v417_v46  ;;  %v430_v24 = vshrl.u32 %v2992_v63, 16 }
  0x31   : > { %v423_v20 = vrot.slane %v422_v1, 4  ;;  %v517_v21 = vrot.slane %v515_v2, 4  ;;  %2525 = vmatmul.mubr.msk.bf16.vlgmr.msra.gmra.mxu1 %vm575_vm3, %v3002_v9  ;;  %v433_v27 = vshll.u32 %v2992_v63, 16  ;;  %v439_v31 = vshll.u32 %v3000_v8, 16 }
  0x32   : > { %v509_v25 = vrot.slane %v508_v10, 4  ;;  %v523_v26 = vrot.slane %v521_v16, 5  ;;  %2533 = vmatpush3.bf16.msra.mxu1 %v2890_v15  ;;  %v432_v39 = vrot.slane %v430_v24, 4  ;;  %v443_v41 = vshrl.u32 %v3000_v8, 16 }
  0x33   : > { %v428_v36 = vsel %vm2905_vm4, %v423_v20, %v427_v53  ;;  %v518_v37 = vor.u32 %v517_v21, %v513_v12  ;;  %v435_v46 = vrot.slane %v433_v27, 5  ;;  %v441_v47 = vrot.slane %v439_v31, 5  ;;  %2682 = vmatprep.subr.msk.bf16.mxu1 %vm600_vm0, %v3008_v17  ;;  %v3041_v53 = vld [vmem:[%s2864_s10 + $0x5c] sm:$0x1] }
  0x34   : > { %v3030_v43 = vcombine.low %v418_v18, %v428_v36  ;;  %v514_v45 = vsel %vm2905_vm4, %v509_v25, %v513_v12  ;;  %v445_v48 = vrot.slane %v443_v41, 4  ;;  %v449_v49 = vshll.u32 %v3013_v22, 16 }
  0x35   : > { %v519_v15 = vrot.slane %v518_v37, 4  ;;  %v526_v50 = vshrl.u32 %v3021_v35, 16  ;;  %v436_v51 = vor.u32 %v435_v46, %v432_v39  ;;  %v529_v55 = vshll.u32 %v3021_v35, 16 }
  0x36   : > { %2520 = vmatprep.mubr.msk.bf16.mxu0 %vm575_vm3, %v3030_v43  ;;  %v535_v56 = vshll.u32 %v3028_v42, 16  ;;  %v539_v59 = vshrl.u32 %v3028_v42, 16  ;;  %v446_v34 = vor.u32 %v445_v48, %v441_v47  ;;  %v451_v0 = vrot.slane %v449_v49, 5 }
  0x37   : > { %v524_v60 = vsel %vm2905_vm4, %v519_v15, %v523_v26  ;;  %v528_v1 = vrot.slane %v526_v50, 4  ;;  %v437_v10 = vrot.slane %v436_v51, 4  ;;  %v531_v12 = vrot.slane %v529_v55, 5 }
  0x38   : > { %v3048_v2 = vcombine.low %v514_v45, %v524_v60  ;;  %v537_v16 = vrot.slane %v535_v56, 5  ;;  %v447_v18 = vrot.slane %v446_v34, 4  ;;  %v541_v20 = vrot.slane %v539_v59, 4 }
  0x39   : > { %v545_v21 = vshll.u32 %v3041_v53, 16  ;;  %v2265_v25 = vrot.slane %v2867_v4, 9  ;;  %v888_v26 = vrot.slane %v2913_v40, 5  ;;  %v442_v27 = vsel %vm2905_vm4, %v437_v10, %v441_v47 }
  0x3a   : > { %2528 = vmatprep.mubr.msk.bf16.mxu1 %vm575_vm3, %v3048_v2  ;;  %v532_v31 = vor.u32 %v531_v12, %v528_v1  ;;  %v878_v36 = vrot.slane %v2870_v5, 5  ;;  %v452_v37 = vsel %vm2905_vm4, %v447_v18, %v451_v0  ;;  %v542_v39 = vor.u32 %v541_v20, %v537_v16 }
  0x3b   : > { %v547_v41 = vrot.slane %v545_v21, 5  ;;  %v2266_v45 = vrot.slane %v2898_v28, 9  ;;  %v3068_v46 = vcombine.low %v442_v27, %v452_v37  ;;  %v2249_v49 = vcombine.low %v2867_v4, %v2870_v5 }
  0x3c   : > { %v533_v40 = vrot.slane %v532_v31, 4  ;;  %v879_v15 = vsel %vm3053_vm7, %v2265_v25, %v878_v36  ;;  %v880_v47 = vrot.slane %v878_v36, 4  ;;  %v543_v48 = vrot.slane %v542_v39, 4  ;;  %v3127_v36 = vld [vmem:[%s3647_s2 + $0xc] sm:$0x3] }
  0x3d   : > { %v886_v50 = vsel %vm3053_vm7, %v2266_v45, %v885_v61  ;;  %v887_v51 = vrot.slane %v885_v61, 4  ;;  %2521 = vmatmul.mubr.msk.bf16.gmra.mxu0 %vm575_vm3, %v3068_v46  ;;  %v2267_v4 = vrot.slane %v2942_v3, 9  ;;  %v892_v5 = vrot.slane %v2951_v19, 5 }
  0x3e   : > { %v538_v55 = vsel %vm2905_vm4, %v533_v40, %v537_v16  ;;  %v882_v56 = vsel %vm3053_vm7, %v880_v47, %v881_v58  ;;  %v548_v59 = vsel %vm2905_vm4, %v543_v48, %v547_v41  ;;  %v895_v34 = vrot.slane %v2958_v23, 5  ;;  %v3158_v41 = vld [vmem:[%s3647_s2 + $0xa] sm:$0x3] }
  0x3f   : > { %v2274_v61 = vcombine.low %v879_v15, %v882_v56  ;;  %v889_v60 = vsel %vm3053_vm7, %v887_v51, %v888_v26  ;;  %v3100_v6 = vcombine.low %v538_v55, %v548_v59  ;;  %v893_v58 = vsel %vm3053_vm7, %v2267_v4, %v892_v5  ;;  %v3192_v55 = vld [vmem:[%s3177_s7 + $0xc] sm:$0xf]  ;;  %v3195_v56 = vld [vmem:[%s3177_s7 + $0x10] sm:$0xf] }
  0x40   : > { %v894_v0 = vrot.slane %v892_v5, 4  ;;  %v899_v1 = vrot.slane %v3000_v8, 5  ;;  %v3108_v10 = vcombine.low %v886_v50, %v889_v60  ;;  %v906_v12 = vrot.slane %v2884_v13, 5 }
  0x41   : > { %2552 = vmatprep.mubr.msk.bf16.mxu0 %vm575_vm3, %v2274_v61  ;;  %2529 = vmatmul.mubr.msk.bf16.gmra.mxu1 %vm575_vm3, %v3100_v6  ;;  %v2268_v18 = vrot.slane %v2992_v63, 9  ;;  %v902_v21 = vrot.slane %v3013_v22, 5  ;;  %v909_v25 = vrot.slane %v2887_v14, 5  ;;  %v1257_v26 = vsel %vm600_vm0, %v2973_v38, 0 }
  0x42   : > { %v896_v23 = vsel %vm3053_vm7, %v894_v0, %v895_v34  ;;  %2534 = vmatprep.mubr.msk.bf16.mxu1 %vm575_vm3, %v2249_v49  ;;  %v901_v20 = vrot.slane %v899_v1, 4  ;;  %v2269_v27 = vrot.slane %v2880_v11, 9  ;;  %v908_v31 = vrot.slane %v906_v12, 4 }
  0x43   : > { %v3115_v16 = vcombine.low %v893_v58, %v896_v23  ;;  %v3131_v37 = vcombine.low %v2898_v28, %v2901_v29  ;;  %v3137_v14 = vcombine.low %v2942_v3, %v2951_v19  ;;  %v900_v38 = vsel %vm3053_vm7, %v2268_v18, %v899_v1 }
  0x44   : > { %v903_v22 = vsel %vm3053_vm7, %v901_v20, %v902_v21  ;;  %v913_v28 = vrot.slane %v2928_v57, 5  ;;  %v1109_v29 = vsel %vm600_vm0, %v3008_v17, 0  ;;  %v907_v39 = vsel %vm3053_vm7, %v2269_v27, %v906_v12 }
  0x45   : > { %2553 = vmatmul.mubr.msk.bf16.vlgmr.msra.gmra.mxu0 %vm575_vm3, %v3108_v10  ;;  %v910_v3 = vsel %vm3053_vm7, %v908_v31, %v909_v25  ;;  %v920_v19 = vrot.slane %v2978_v44, 5  ;;  %v3162_v17 = vcombine.low %v900_v38, %v903_v22  ;;  %v2270_v45 = vrot.slane %v2924_v52, 9 }
  0x46   : > { %2587 = vmatpush3.bf16.msra.mxu0 %v1257_v26  ;;  %2556 = vmatprep.mubr.msk.bf16.mxu0 %vm575_vm3, %v3115_v16  ;;  %v3167_v40 = vcombine.low %v907_v39, %v910_v3  ;;  %v915_v15 = vrot.slane %v913_v28, 4  ;;  %v916_v47 = vrot.slane %v2936_v62, 5  ;;  %v2271_v48 = vrot.slane %v2965_v32, 9 }
  0x47   : > { %2685 = vmatprep.subr.msk.bf16.mxu0 %vm600_vm0, %v3127_v36  ;;  %v922_v49 = vrot.slane %v920_v19, 4  ;;  %v923_v50 = vrot.slane %v2986_v54, 5  ;;  %v3181_v51 = vcombine.low %v2992_v63, %v3000_v8  ;;  %v3187_v62 = vcombine.low %v2880_v11, %v2884_v13  ;;  %v352_v13 = vld [vmem:[%s3177_s7 + $0x14] sm:$0x1] }
  0x48   : > { %v914_v54 = vsel %vm3053_vm7, %v2270_v45, %v913_v28  ;;  %v917_v63 = vsel %vm3053_vm7, %v915_v15, %v916_v47  ;;  %v927_v8 = vrot.slane %v3028_v42, 5  ;;  %v1631_v4 = vshrl.u32 %v3192_v55, 16 }
  0x49   : > { %2535 = vmatmul.mubr.msk.bf16.vlgmr.msra.gmra.mxu1 %vm575_vm3, %v3131_v37  ;;  %v1634_v11 = vshll.u32 %v3192_v55, 16  ;;  %v921_v5 = vsel %vm3053_vm7, %v2271_v48, %v920_v19  ;;  %v924_v59 = vsel %vm3053_vm7, %v922_v49, %v923_v50  ;;  %v1644_v61 = vshrl.u32 %v3195_v56, 16 }
  0x4a   : > { %2569 = vmatpush3.bf16.msra.mxu1 %v1109_v29  ;;  %2538 = vmatprep.mubr.msk.bf16.mxu1 %vm575_vm3, %v3137_v14  ;;  %v2272_v60 = vrot.slane %v3021_v35, 9  ;;  %v1633_v34 = vrot.slane %v1631_v4, 4  ;;  %v1640_v0 = vshll.u32 %v3195_v56, 16  ;;  %v3214_v1 = vcombine.low %v914_v54, %v917_v63  ;;  %v3276_v63 = vld [vmem:[%s3177_s7] sm:$0xf] }
  0x4b   : > { %2684 = vmatprep.subr.msk.bf16.mxu1 %vm600_vm0, %v3158_v41  ;;  %v1636_v58 = vrot.slane %v1634_v11, 5  ;;  %v930_v23 = vrot.slane %v3041_v53, 5  ;;  %v1646_v12 = vrot.slane %v1644_v61, 4  ;;  %v1650_v18 = vshll.u32 %v352_v13, 16  ;;  %v2331_v11 = vld [vmem:[%s3647_s2 + $0xe] sm:$0x3] }
  0x4c   : > { %v3219_v20 = vcombine.low %v921_v5, %v924_v59  ;;  %v929_v21 = vrot.slane %v927_v8, 4  ;;  %v1642_v26 = vrot.slane %v1640_v0, 5  ;;  %v2341_v27 = vrot.slane %v3192_v55, 9 }
  0x4d   : > { %2557 = vmatmul.mubr.msk.bf16.gmra.mxu0 %vm575_vm3, %v3162_v17  ;;  %v1637_v25 = vor.u32 %v1636_v58, %v1633_v34  ;;  %v1781_v31 = vrot.slane %v3195_v56, 5  ;;  %v1652_v28 = vrot.slane %v1650_v18, 5  ;;  %v1784_v29 = vrot.slane %v352_v13, 5 }
  0x4e   : > { %2560 = vmatprep.mubr.msk.bf16.mxu0 %vm575_vm3, %v3167_v40  ;;  %v1647_v22 = vor.u32 %v1646_v12, %v1642_v26  ;;  %v3225_v53 = vcombine.low %v2924_v52, %v2928_v57  ;;  %v3231_v39 = vcombine.low %v2965_v32, %v2978_v44  ;;  %v928_v45 = vsel %vm3053_vm7, %v2272_v60, %v927_v8  ;;  %v3279_v8 = vld [vmem:[%s3177_s7 + $0x4] sm:$0xf]  ;;  %v349_v60 = vld [vmem:[%s3177_s7 + $0x8] sm:$0x1] }
  0x4f   : > { %v1638_v38 = vrot.slane %v1637_v25, 4  ;;  %v3235_v3 = vsel %vm3053_vm7, %v2341_v27, %v1781_v31  ;;  %v1783_v19 = vrot.slane %v1781_v31, 4  ;;  %v931_v52 = vsel %vm3053_vm7, %v929_v21, %v930_v23 }
  0x50   : > { %v1648_v32 = vrot.slane %v1647_v22, 4  ;;  %v3255_v48 = vcombine.low %v928_v45, %v931_v52  ;;  %v3263_v50 = vcombine.low %v3021_v35, %v3028_v42  ;;  %v1515_v54 = vsel %vm600_vm0, %v3127_v36, 0  ;;  %v2342_v35 = vld [vmem:[%s3647_s2 + $0x10] sm:$0x3] }
  0x51   : > { %2539 = vmatmul.mubr.msk.bf16.gmra.mxu1 %vm575_vm3, %v3181_v51  ;;  %v1643_v57 = vsel %vm2905_vm4, %v1638_v38, %v1642_v26  ;;  %v3247_v44 = vsel %vm3053_vm7, %v1783_v19, %v1784_v29  ;;  %v1228_v42 = vshll.u32 %v3276_v63, 16  ;;  %v1238_v36 = vshrl.u32 %v3279_v8, 16 }
  0x52   : > { %2542 = vmatprep.mubr.msk.bf16.mxu1 %vm575_vm3, %v3187_v62  ;;  %v1653_v15 = vsel %vm2905_vm4, %v1648_v32, %v1652_v28  ;;  %v2343_v47 = vcombine.low %v3235_v3, %v3247_v44  ;;  %v1389_v4 = vsel %vm600_vm0, %v3158_v41, 0  ;;  %v1244_v58 = vshll.u32 %v349_v60, 16 }
  0x53   : > { %v3257_v49 = vcombine.low %v1643_v57, %v1653_v15  ;;  %v1230_v5 = vrot.slane %v1228_v42, 5  ;;  %v1240_v61 = vrot.slane %v1238_v36, 4  ;;  %v2291_v26 = vcombine.low %v3276_v63, %v3279_v8 }
  0x54   : > { %v1246_v12 = vrot.slane %v1244_v58, 5  ;;  %v1795_v30 = vsel %vm600_vm0, %v2342_v35, 0  ;;  %v1663_v27 = vsel %vm600_vm0, %v2331_v11, 0  ;;  %v2322_v31 = vcombine.low %v3192_v55, %v3195_v56 }
  0x55   : > { %2561 = vmatmul.mubr.msk.bf16.gmra.mxu0 %vm575_vm3, %v3214_v1 }
  0x56   : > { %2564 = vmatprep.mubr.msk.bf16.mxu0 %vm575_vm3, %v3219_v20 }
  0x59   : > { %2543 = vmatmul.mubr.msk.bf16.gmra.mxu1 %vm575_vm3, %v3225_v53 }
  0x5a   : > { %2546 = vmatprep.mubr.msk.bf16.mxu1 %vm575_vm3, %v3231_v39 }
  0x5d   : > { %2565 = vmatmul.mubr.msk.bf16.gmra.mxu0 %vm575_vm3, %v3255_v48 }
  0x5e   : > { %2588 = vmatprep.mubr.msk.bf16.mxu0 %vm575_vm3, %v2967_v33  ;;  %v1225_v33 = vshrl.u32 %v3276_v63, 16 }
  0x60   : > { %v1227_v13 = vrot.slane %v1225_v33, 4 }
  0x61   : > { %2547 = vmatmul.mubr.msk.bf16.gmra.mxu1 %vm575_vm3, %v3263_v50 }
  0x62   : > { %2570 = vmatprep.mubr.msk.bf16.mxu1 %vm575_vm3, %v3131_v37  ;;  %v1234_v37 = vshll.u32 %v3279_v8, 16  ;;  %v1231_v41 = vor.u32 %v1230_v5, %v1227_v13 }
  0x64   : > { %v1236_v59 = vrot.slane %v1234_v37, 5  ;;  %v1232_v0 = vrot.slane %v1231_v41, 4 }
  0x65   : > { %2589 = vmatmul.mubr.msk.bf16.vlgmr.msra.gmra.mxu0 %vm575_vm3, %v3030_v43 }
  0x66   : > { %2623 = vmatpush3.bf16.msra.mxu0 %v1515_v54  ;;  %2592 = vmatprep.mubr.msk.bf16.mxu0 %vm575_vm3, %v3068_v46  ;;  %v1241_v34 = vor.u32 %v1240_v61, %v1236_v59  ;;  %v1237_v18 = vsel %vm2905_vm4, %v1232_v0, %v1236_v59 }
  0x67   : > { %2687 = vmatprep.subr.msk.bf16.mxu0 %vm600_vm0, %v2342_v35 }
  0x68   : > { %v1242_v23 = vrot.slane %v1241_v34, 4 }
  0x69   : > { %2571 = vmatmul.mubr.msk.bf16.vlgmr.msra.gmra.mxu1 %vm575_vm3, %v3137_v14 }
  0x6a   : > { %2605 = vmatpush3.bf16.msra.mxu1 %v1389_v4  ;;  %2574 = vmatprep.mubr.msk.bf16.mxu1 %vm575_vm3, %v3181_v51  ;;  %v1247_v21 = vsel %vm2905_vm4, %v1242_v23, %v1246_v12 }
  0x6b   : > { %2686 = vmatprep.subr.msk.bf16.mxu1 %vm600_vm0, %v2331_v11  ;;  %v2301_v25 = vcombine.low %v1237_v18, %v1247_v21 }
  0x6d   : > { %2593 = vmatmul.mubr.msk.bf16.gmra.mxu0 %vm575_vm3, %v2944_v7 }
  0x6e   : > { %2596 = vmatprep.mubr.msk.bf16.mxu0 %vm575_vm3, %v3002_v9 }
  0x71   : > { %2575 = vmatmul.mubr.msk.bf16.gmra.mxu1 %vm575_vm3, %v3187_v62 }
  0x72   : > { %2578 = vmatprep.mubr.msk.bf16.mxu1 %vm575_vm3, %v3225_v53 }
  0x75   : > { %2597 = vmatmul.mubr.msk.bf16.gmra.mxu0 %vm575_vm3, %v3048_v2 }
  0x76   : > { %2600 = vmatprep.mubr.msk.bf16.mxu0 %vm575_vm3, %v3100_v6 }
  0x79   : > { %2579 = vmatmul.mubr.msk.bf16.gmra.mxu1 %vm575_vm3, %v3231_v39 }
  0x7a   : > { %2582 = vmatprep.mubr.msk.bf16.mxu1 %vm575_vm3, %v3263_v50 }
  0x7d   : > { %2601 = vmatmul.mubr.msk.bf16.gmra.mxu0 %vm575_vm3, %v2301_v25 }
  0x7e   : > { %2624 = vmatprep.mubr.msk.bf16.mxu0 %vm575_vm3, %v3137_v14  ;;  %v2310_v14 = vrot.slane %v3276_v63, 9 }
  0x81   : > { %2583 = vmatmul.mubr.msk.bf16.gmra.mxu1 %vm575_vm3, %v2291_v26 }
  0x82   : > { %2606 = vmatprep.mubr.msk.bf16.mxu1 %vm575_vm3, %v3108_v10  ;;  %v1375_v10 = vrot.slane %v3279_v8, 5 }
  0x84   : > { %v1376_v38 = vsel %vm3053_vm7, %v2310_v14, %v1375_v10 }
  0x85   : > { %2625 = vmatmul.mubr.msk.bf16.vlgmr.msra.gmra.mxu0 %vm575_vm3, %v3181_v51  ;;  %v1377_v51 = vrot.slane %v1375_v10, 4 }
  0x86   : > { %2659 = vmatpush3.bf16.msra.mxu0 %v1795_v30  ;;  %2628 = vmatprep.mubr.msk.bf16.mxu0 %vm575_vm3, %v3187_v62  ;;  %v1378_v62 = vrot.slane %v349_v60, 5 }
  0x88   : > { %v1379_v22 = vsel %vm3053_vm7, %v1377_v51, %v1378_v62 }
  0x89   : > { %2607 = vmatmul.mubr.msk.bf16.vlgmr.msra.gmra.mxu1 %vm575_vm3, %v3115_v16  ;;  %v2312_v28 = vcombine.low %v1376_v38, %v1379_v22 }
  0x8a   : > { %2641 = vmatpush3.bf16.msra.mxu1 %v1663_v27  ;;  %2610 = vmatprep.mubr.msk.bf16.mxu1 %vm575_vm3, %v3162_v17 }
  0x8d   : > { %2629 = vmatmul.mubr.msk.bf16.gmra.mxu0 %vm575_vm3, %v3225_v53 }
  0x8e   : > { %2632 = vmatprep.mubr.msk.bf16.mxu0 %vm575_vm3, %v3231_v39 }
  0x91   : > { %2611 = vmatmul.mubr.msk.bf16.gmra.mxu1 %vm575_vm3, %v3167_v40 }
  0x92   : > { %2614 = vmatprep.mubr.msk.bf16.mxu1 %vm575_vm3, %v3214_v1 }
  0x95   : > { %2633 = vmatmul.mubr.msk.bf16.gmra.mxu0 %vm575_vm3, %v3263_v50 }
  0x96   : > { %2636 = vmatprep.mubr.msk.bf16.mxu0 %vm575_vm3, %v2291_v26 }
  0x99   : > { %2615 = vmatmul.mubr.msk.bf16.gmra.mxu1 %vm575_vm3, %v3219_v20 }
  0x9a   : > { %2618 = vmatprep.mubr.msk.bf16.mxu1 %vm575_vm3, %v3255_v48 }
  0x9d   : > { %2637 = vmatmul.mubr.msk.bf16.gmra.mxu0 %vm575_vm3, %v2322_v31 }
  0x9e   : > { %2660 = vmatprep.mubr.msk.bf16.mxu0 %vm575_vm3, %v3115_v16 }
  0xa1   : > { %2619 = vmatmul.mubr.msk.bf16.gmra.mxu1 %vm575_vm3, %v2312_v28 }
  0xa2   : > { %2642 = vmatprep.mubr.msk.bf16.mxu1 %vm575_vm3, %v3030_v43 }
  0xa5   : > { %2661 = vmatmul.mubr.msk.bf16.vlgmr.msra.gmra.mxu0 %vm575_vm3, %v3162_v17 }
  0xa6   : > { %2664 = vmatprep.mubr.msk.bf16.mxu0 %vm575_vm3, %v3167_v40 }
  0xa9   : > { %2643 = vmatmul.mubr.msk.bf16.vlgmr.msra.gmra.mxu1 %vm575_vm3, %v3068_v46 }
  0xaa   : > { %2646 = vmatprep.mubr.msk.bf16.mxu1 %vm575_vm3, %v2944_v7 }
  0xad   : > { %2665 = vmatmul.mubr.msk.bf16.gmra.mxu0 %vm575_vm3, %v3214_v1 }
  0xae   : > { %2668 = vmatprep.mubr.msk.bf16.mxu0 %vm575_vm3, %v3219_v20 }
  0xb1   : > { %2647 = vmatmul.mubr.msk.bf16.gmra.mxu1 %vm575_vm3, %v3002_v9 }
  0xb2   : > { %2650 = vmatprep.mubr.msk.bf16.mxu1 %vm575_vm3, %v3048_v2 }
  0xb5   : > { %2669 = vmatmul.mubr.msk.bf16.gmra.mxu0 %vm575_vm3, %v3255_v48 }
  0xb6   : > { %2672 = vmatprep.mubr.msk.bf16.mxu0 %vm575_vm3, %v2312_v28 }
  0xb9   : > { %2651 = vmatmul.mubr.msk.bf16.gmra.mxu1 %vm575_vm3, %v3100_v6 }
  0xba   : > { %2654 = vmatprep.mubr.msk.bf16.mxu1 %vm575_vm3, %v2301_v25 }
  0xbd   : > { %2673 = vmatmul.mubr.msk.bf16.gmra.mxu0 %vm575_vm3, %v2343_v47 }
  0xc1   : > { %2655 = vmatmul.mubr.msk.bf16.gmra.mxu1 %vm575_vm3, %v3257_v49 }
  0xec   : > { %v2518_v7 = vpop.f32.mrf.mxu0 }
  0xee   : > { %v638_v43 = vpop.f32.mrf.mxu0 }
  0xf0   : > { %v2519_v24 = vpop.f32.mrf.mxu0 }
  0xf1   : > { %v2526_v9 = vpop.f32.mrf.mxu1 }
  0xf2   : > { %v641_v16 = vpop.f32.mrf.mxu0 }
  0xf3   : > { %v670_v2 = vpop.f32.mrf.mxu1 }
  0xf5   : > { %v2527_v46 = vpop.f32.mrf.mxu1 }
  0xf7   : > { %v673_v17 = vpop.f32.mrf.mxu1 }
  0xfd   : > { %v2522_v40 = vpop.f32.mrf.mxu0 }
  0xff   : > { %v654_v6 = vpop.f32.mrf.mxu0 }
 0x101   : > { %v2530_v55 = vpop.f32.mrf.mxu1  ;;  %v2523_v56 = vpop.f32.mrf.mxu0 }
 0x103   : > { %v686_v1 = vpop.f32.mrf.mxu1  ;;  %v657_v20 = vpop.f32.mrf.mxu0 }
 0x105   : > { %v2531_v29 = vpop.f32.mrf.mxu1  ;;  %v2554_v53 = vpop.f32.mrf.mxu0 }
 0x107   : > { %v3399_v39 = vpop.f32.mrf.mxu1  ;;  %v1019_v3 = vpop.f32.mrf.mxu0 }
 0x109   : > { %v2536_v19 = vpop.f32.mrf.mxu1  ;;  %v2555_v45 = vpop.f32.mrf.mxu0 }
 0x10a   : > { %v811_v52 = vadd.f32 %v2536_v19, %v2518_v7 }
 0x10b   : > { %v802_v57 = vpop.f32.mrf.mxu1  ;;  %v1022_v32 = vpop.f32.mrf.mxu0 }
 0x10c   : > { %v3401_v44 = vadd.f32 %v2554_v53, %v811_v52  ;;  %v803_v15 = vadd.f32 %v802_v57, %v638_v43 }
 0x10d   : > { %v2537_v47 = vpop.f32.mrf.mxu1  ;;  %v2558_v48 = vpop.f32.mrf.mxu0 }
 0x10e   : > { %v3403_v49 = vadd.f32 %v1019_v3, %v803_v15  ;;  %v814_v50 = vadd.f32 %v2537_v47, %v2519_v24 }
 0x10f   : > { %v805_v54 = vpop.f32.mrf.mxu1  ;;  %v1035_v63 = vpop.f32.mrf.mxu0 }
 0x110   : > { %v3405_v8 = vadd.f32 %v2555_v45, %v814_v50  ;;  %v806_v35 = vadd.f32 %v805_v54, %v641_v16 }
 0x111   : > { %v2540_v33 = vpop.f32.mrf.mxu1  ;;  %v2559_v42 = vpop.f32.mrf.mxu0 }
 0x112   : > { %v3407_v36 = vadd.f32 %v1022_v32, %v806_v35  ;;  %v827_v37 = vadd.f32 %v2540_v33, %v2522_v40 }
 0x113   : > { %v818_v4 = vpop.f32.mrf.mxu1  ;;  %v1038_v11 = vpop.f32.mrf.mxu0 }
 0x114   : > { %v3409_v13 = vadd.f32 %v2558_v48, %v827_v37  ;;  %v819_v5 = vadd.f32 %v818_v4, %v654_v6 }
 0x115   : > { %v2541_v59 = vpop.f32.mrf.mxu1  ;;  %v2562_v61 = vpop.f32.mrf.mxu0 }
 0x116   : > { %v3411_v60 = vadd.f32 %v1035_v63, %v819_v5  ;;  %v830_v41 = vadd.f32 %v2541_v59, %v2523_v56 }
 0x117   : > { %v821_v34 = vpop.f32.mrf.mxu1  ;;  %v1051_v58 = vpop.f32.mrf.mxu0 }
 0x118   : > { %v3413_v0 = vadd.f32 %v2559_v42, %v830_v41  ;;  %v822_v23 = vadd.f32 %v821_v34, %v657_v20 }
 0x119   : > { %v2544_v12 = vpop.f32.mrf.mxu1  ;;  %v2563_v18 = vpop.f32.mrf.mxu0 }
 0x11a   : > { %v3415_v21 = vadd.f32 %v1038_v11, %v822_v23  ;;  %v843_v25 = vadd.f32 %v2544_v12, %v2526_v9 }
 0x11b   : > { %v834_v26 = vpop.f32.mrf.mxu1  ;;  %v1054_v30 = vpop.f32.mrf.mxu0 }
 0x11c   : > { %v3417_v27 = vadd.f32 %v2562_v61, %v843_v25  ;;  %v835_v10 = vadd.f32 %v834_v26, %v670_v2 }
 0x11d   : > { %v2545_v14 = vpop.f32.mrf.mxu1  ;;  %v2566_v51 = vpop.f32.mrf.mxu0 }
 0x11e   : > { %v3419_v62 = vadd.f32 %v1051_v58, %v835_v10  ;;  %v846_v31 = vadd.f32 %v2545_v14, %v2527_v46 }
 0x11f   : > { %v837_v38 = vpop.f32.mrf.mxu1  ;;  %v1067_v22 = vpop.f32.mrf.mxu0 }
 0x120   : > { %v3421_v28 = vadd.f32 %v2563_v18, %v846_v31  ;;  %v838_v7 = vadd.f32 %v837_v38, %v673_v17 }
 0x121   : > { %v2548_v43 = vpop.f32.mrf.mxu1  ;;  %v2567_v24 = vpop.f32.mrf.mxu0 }
 0x122   : > { %v3423_v16 = vadd.f32 %v1054_v30, %v838_v7  ;;  %v859_v9 = vadd.f32 %v2548_v43, %v2530_v55 }
 0x123   : > { %v850_v40 = vpop.f32.mrf.mxu1  ;;  %v1070_v6 = vpop.f32.mrf.mxu0 }
 0x124   : > { %v3425_v56 = vadd.f32 %v2566_v51, %v859_v9  ;;  %v851_v2 = vadd.f32 %v850_v40, %v686_v1 }
 0x125   : > { %v2549_v20 = vpop.f32.mrf.mxu1  ;;  %v3427_v53 = vpop.f32.mrf.mxu0 }
 0x126   : > { %v3429_v3 = vadd.f32 %v1067_v22, %v851_v2  ;;  %v862_v46 = vadd.f32 %v2549_v20, %v2531_v29 }
 0x127   : > { %v853_v19 = vpop.f32.mrf.mxu1  ;;  %v3431_v45 = vpop.f32.mrf.mxu0 }
 0x128   : > { %v3433_v17 = vadd.f32 %v2567_v24, %v862_v46  ;;  %v854_v52 = vadd.f32 %v853_v19, %v3399_v39 }
 0x129   : > { %v2572_v57 = vpop.f32.mrf.mxu1  ;;  %v3436_v55 = vpop.f32.mrf.mxu0 }
 0x12a   : > { %v3438_v32 = vadd.f32 %v1070_v6, %v854_v52 }
 0x12b   : > { %v1145_v15 = vpop.f32.mrf.mxu1  ;;  %v3440_v1 = vpop.f32.mrf.mxu0 }
 0x12c   : > { %3654 = vst [vmem:[#allocation2_spill] sm:$0xff] %v3438_v32 }
 0x12d   : > { %v2573_v47 = vpop.f32.mrf.mxu1  ;;  %v3442_v48 = vpop.f32.mrf.mxu0 }
 0x12f   : > { %v1148_v50 = vpop.f32.mrf.mxu1  ;;  %v3444_v29 = vpop.f32.mrf.mxu0 }
 0x131   : > { %v3446_v54 = vpop.f32.mrf.mxu1  ;;  %v3448_v63 = vpop.f32.mrf.mxu0 }
 0x133   : > { %v3450_v35 = vpop.f32.mrf.mxu1  ;;  %v3452_v39 = vpop.f32.mrf.mxu0 }
 0x135   : > { %v3454_v33 = vpop.f32.mrf.mxu1  ;;  %v3456_v42 = vpop.f32.mrf.mxu0 }
 0x137   : > { %v3458_v37 = vpop.f32.mrf.mxu1  ;;  %v3460_v4 = vpop.f32.mrf.mxu0 }
 0x139   : > { %v3462_v11 = vpop.f32.mrf.mxu1  ;;  %v3464_v5 = vpop.f32.mrf.mxu0 }
 0x13b   : > { %v3466_v59 = vpop.f32.mrf.mxu1  ;;  %v3468_v61 = vpop.f32.mrf.mxu0 }
 0x13d   : > { %v3470_v41 = vpop.f32.mrf.mxu1  ;;  %v3472_v34 = vpop.f32.mrf.mxu0 }
 0x13e   : > { %3655 = vst [vmem:[#allocation3_spill] sm:$0xff] %v3472_v34 }
 0x13f   : > { %v3474_v58 = vpop.f32.mrf.mxu1  ;;  %v3476_v23 = vpop.f32.mrf.mxu0 }
 0x140   : > { %3656 = vst [vmem:[#allocation4_spill] sm:$0xff] %v3476_v23 }
 0x141   : > { %v3478_v12 = vpop.f32.mrf.mxu1  ;;  %v3480_v18 = vpop.f32.mrf.mxu0 }
 0x142   : > { %3657 = vst [vmem:[#allocation5_spill] sm:$0xff] %v3480_v18 }
 0x143   : > { %v3482_v25 = vpop.f32.mrf.mxu1  ;;  %v3484_v26 = vpop.f32.mrf.mxu0 }
 0x144   : > { %3658 = vst [vmem:[#allocation6_spill] sm:$0xff] %v3484_v26 }
 0x145   : > { %v3486_v30 = vpop.f32.mrf.mxu1  ;;  %v2626_v10 = vpop.f32.mrf.mxu0 }
 0x146   : > { %3659 = vst [vmem:[#allocation7_spill] sm:$0xff] %v3486_v30  ;;  %v1210_v30 = vadd.f32 %v2572_v57, %v3401_v44  ;;  %v1209_v44 = vadd.f32 %v1148_v50, %v3407_v36  ;;  %v1215_v50 = vadd.f32 %v3454_v33, %v3413_v0 }
 0x147   : > { %v3488_v14 = vpop.f32.mrf.mxu1  ;;  %v1551_v51 = vpop.f32.mrf.mxu0 }
 0x148   : > { %3660 = vst [vmem:[#allocation8_spill] sm:$0xff] %v3488_v14 }
 0x149   : > { %v2608_v31 = vpop.f32.mrf.mxu1  ;;  %v2627_v38 = vpop.f32.mrf.mxu0 }
 0x14b   : > { %v1425_v22 = vpop.f32.mrf.mxu1  ;;  %v3490_v7 = vpop.f32.mrf.mxu0 }
 0x14d   : > { %v2609_v43 = vpop.f32.mrf.mxu1  ;;  %v3492_v24 = vpop.f32.mrf.mxu0 }
 0x14f   : > { %v1428_v9 = vpop.f32.mrf.mxu1  ;;  %v3494_v40 = vpop.f32.mrf.mxu0 }
 0x150   : > { %3661 = vst [vmem:[#allocation9_spill] sm:$0xff] %v3494_v40 }
 0x151   : > { %v2612_v6 = vpop.f32.mrf.mxu1  ;;  %v3496_v2 = vpop.f32.mrf.mxu0 }
 0x152   : > { %3662 = vst [vmem:[#allocation10_spill] sm:$0xff] %v3496_v2 }
 0x153   : > { %v3498_v20 = vpop.f32.mrf.mxu1  ;;  %v3500_v46 = vpop.f32.mrf.mxu0 }
 0x154   : > { %3663 = vst [vmem:[#allocation11_spill] sm:$0xff] %v3500_v46 }
 0x155   : > { %v3502_v19 = vpop.f32.mrf.mxu1  ;;  %v3504_v52 = vpop.f32.mrf.mxu0 }
 0x156   : > { %3664 = vst [vmem:[#allocation12_spill] sm:$0xff] %v3504_v52 }
 0x157   : > { %v3506_v26 = vpop.f32.mrf.mxu1  ;;  %v3508_v14 = vpop.f32.mrf.mxu0 }
 0x158   : > { %3665 = vst [vmem:[#allocation13_spill] sm:$0xff] %v3508_v14  ;;  %v1208_v14 = vadd.f32 %v1145_v15, %v3403_v49 }
 0x159   : > { %v3510_v32 = vpop.f32.mrf.mxu1  ;;  %v3512_v18 = vpop.f32.mrf.mxu0 }
 0x15a   : > { %3666 = vst [vmem:[#allocation14_spill] sm:$0xff] %v3510_v32  ;;  %3667 = vst [vmem:[#allocation15_spill] sm:$0xff] %v3512_v18 }
 0x15b   : > { %v3514_v23 = vpop.f32.mrf.mxu1  ;;  %v3516_v34 = vpop.f32.mrf.mxu0 }
 0x15c   : > { %3668 = vst [vmem:[#allocation16_spill] sm:$0xff] %v3514_v23  ;;  %3669 = vst [vmem:[#allocation17_spill] sm:$0xff] %v3516_v34  ;;  %v1211_v34 = vadd.f32 %v2573_v47, %v3405_v8  ;;  %v1214_v8 = vadd.f32 %v3446_v54, %v3409_v13 }
 0x15d   : > { %v3518_v2 = vpop.f32.mrf.mxu1  ;;  %v3520_v46 = vpop.f32.mrf.mxu0 }
 0x15e   : > { %3670 = vst [vmem:[#allocation18_spill] sm:$0xff] %v3518_v2  ;;  %3671 = vst [vmem:[#allocation19_spill] sm:$0xff] %v3520_v46  ;;  %v1358_v46 = vadd.f32 %v3427_v53, %v1210_v30  ;;  %v1359_v15 = vadd.f32 %v3436_v55, %v1211_v34  ;;  %v1357_v53 = vadd.f32 %v3440_v1, %v1209_v44 }
 0x15f   : > { %v3522_v40 = vpop.f32.mrf.mxu1  ;;  %v3524_v52 = vpop.f32.mrf.mxu0  ;;  %v1213_v30 = vadd.f32 %v3458_v37, %v3415_v21  ;;  %v1218_v1 = vadd.f32 %v3462_v11, %v3417_v27  ;;  %v1217_v27 = vadd.f32 %v3474_v58, %v3423_v16 }
 0x160   : > { %3672 = vst [vmem:[#allocation20_spill] sm:$0xff] %v3524_v52  ;;  %v1356_v52 = vadd.f32 %v3431_v45, %v1208_v14  ;;  %v1212_v45 = vadd.f32 %v3450_v35, %v3411_v60  ;;  %v1491_v36 = vadd.f32 %v2609_v43, %v1359_v15  ;;  %v1489_v14 = vadd.f32 %v1428_v9, %v1357_v53 }
 0x161   : > { %v3529_v32 = vpop.f32.mrf.mxu1  ;;  %v3531_v18 = vpop.f32.mrf.mxu0  ;;  %v1216_v60 = vadd.f32 %v3466_v59, %v3419_v62 }
 0x162   : > { %3673 = vst [vmem:[#allocation21_spill] sm:$0xff] %v3529_v32  ;;  %3674 = vst [vmem:[#allocation22_spill] sm:$0xff] %v3531_v18  ;;  %v1490_v18 = vadd.f32 %v2608_v31, %v1358_v46  ;;  %v1488_v32 = vadd.f32 %v1425_v22, %v1356_v52  ;;  %v1362_v31 = vadd.f32 %v3442_v48, %v1214_v8 }
 0x163   : > { %v3534_v23 = vpop.f32.mrf.mxu1  ;;  %v3536_v2 = vpop.f32.mrf.mxu0  ;;  %v1360_v33 = vadd.f32 %v3444_v29, %v1212_v45  ;;  %v1617_v22 = vadd.f32 %v2627_v38, %v1491_v36  ;;  %v1219_v48 = vadd.f32 %v3470_v41, %v3421_v28  ;;  %v1366_v29 = vadd.f32 %v3456_v42, %v1218_v1 }
 0x164   : > { %3675 = vst [vmem:[#allocation23_spill] sm:$0xff] %v3536_v2  ;;  %v1616_v13 = vadd.f32 %v2626_v10, %v1490_v18  ;;  %v1614_v54 = vadd.f32 %v1551_v51, %v1488_v32  ;;  %v1363_v32 = vadd.f32 %v3448_v63, %v1215_v50  ;;  %v1494_v11 = vadd.f32 %v2612_v6, %v1362_v31 }
 0x165   : > { %v3542_v49 = vpop.f32.mrf.mxu1  ;;  %v2662_v57 = vpop.f32.mrf.mxu0  ;;  %v1361_v18 = vadd.f32 %v3452_v39, %v1213_v30  ;;  %v1615_v10 = vadd.f32 %v3490_v7, %v1489_v14  ;;  %v1364_v38 = vadd.f32 %v3460_v4, %v1216_v60  ;;  %v1492_v63 = vadd.f32 %v3498_v20, %v1360_v33  ;;  %v3681_v30 = vld [vmem:[#allocation16_spill] sm:$0xff] }
 0x166   : > { %v1495_v28 = vadd.f32 %v3502_v19, %v1363_v32  ;;  %v1367_v39 = vadd.f32 %v3464_v5, %v1219_v48  ;;  %v1365_v7 = vadd.f32 %v3468_v61, %v1217_v27  ;;  %v1620_v46 = vadd.f32 %v3492_v24, %v1494_v11  ;;  %v3676_v24 = vld [vmem:[#allocation7_spill] sm:$0xff] }
 0x167   : > { %v3547_v47 = vpop.f32.mrf.mxu1  ;;  %v1831_v2 = vpop.f32.mrf.mxu0  ;;  %v1493_v42 = vadd.f32 %v3506_v26, %v1361_v18  ;;  %v1220_v5 = vadd.f32 %v3482_v25, %v3429_v3  ;;  %v1223_v52 = vadd.f32 %v3676_v24, %v3433_v17  ;;  %v3677_v26 = vld [vmem:[#allocation9_spill] sm:$0xff]  ;;  %v3680_v25 = vld [vmem:[#allocation14_spill] sm:$0xff] }
 0x168   : > { %v1618_v44 = vadd.f32 %v3677_v26, %v1492_v63  ;;  %v3685_v63 = vld [vmem:[#allocation13_spill] sm:$0xff] }
 0x169   : > { %v2644_v55 = vpop.f32.mrf.mxu1  ;;  %v2663_v34 = vpop.f32.mrf.mxu0 }
 0x16a   : > { %v1764_v21 = vadd.f32 %v2644_v55, %v1616_v13  ;;  %v3679_v55 = vld [vmem:[#allocation11_spill] sm:$0xff]  ;;  %v1496_v13 = vadd.f32 %v3681_v30, %v1364_v38 }
 0x16b   : > { %v1699_v35 = vpop.f32.mrf.mxu1  ;;  %v1834_v0 = vpop.f32.mrf.mxu0  ;;  %v1619_v3 = vadd.f32 %v3679_v55, %v1493_v42 }
 0x16c   : > { %v1762_v37 = vadd.f32 %v1699_v35, %v1614_v54  ;;  %v1896_v16 = vadd.f32 %v2662_v57, %v1764_v21  ;;  %v3678_v57 = vld [vmem:[#allocation10_spill] sm:$0xff] }
 0x16d   : > { %v2645_v62 = vpop.f32.mrf.mxu1  ;;  %v2666_v59 = vpop.f32.mrf.mxu0  ;;  %v1621_v15 = vadd.f32 %v3678_v57, %v1495_v28  ;;  %v1622_v28 = vadd.f32 %v3685_v63, %v1496_v13 }
 0x16e   : > { %v1765_v51 = vadd.f32 %v2645_v62, %v1617_v22  ;;  %v1894_v58 = vadd.f32 %v1831_v2, %v1762_v37  ;;  %v1222_v2 = vadd.f32 %v3478_v12, %v3425_v56  ;;  %v1933_v31 = vmul.f32 %v1896_v16, %v1896_v16 }
 0x16f   : > { %v1702_v41 = vpop.f32.mrf.mxu1  ;;  %v1847_v43 = vpop.f32.mrf.mxu0 }
 0x170   : > { %v1897_v9 = vadd.f32 %v2663_v34, %v1765_v51  ;;  %v1763_v6 = vadd.f32 %v1702_v41, %v1615_v10  ;;  %v1931_v36 = vmul.f32 %v1894_v58, %v1894_v58  ;;  %v1498_v34 = vadd.f32 %v3680_v25, %v1366_v29  ;;  %v3683_v10 = vld [vmem:[#allocation3_spill] sm:$0xff]  ;;  %v3684_v29 = vld [vmem:[#allocation12_spill] sm:$0xff] }
 0x171   : > { %v2648_v4 = vpop.f32.mrf.mxu1  ;;  %v2667_v20 = vpop.f32.mrf.mxu0  ;;  %v1370_v51 = vadd.f32 %v3683_v10, %v1222_v2  ;;  %v1497_v41 = vadd.f32 %v3522_v40, %v1365_v7 }
 0x172   : > { %v2394_v19 = vpack.c.bf16 %v1897_v9, %v1896_v16  ;;  %v1895_v61 = vadd.f32 %v1834_v0, %v1763_v6  ;;  %v1768_v8 = vadd.f32 %v2648_v4, %v1620_v46  ;;  %v3682_v0 = vld [vmem:[#allocation18_spill] sm:$0xff]  ;;  %v1934_v22 = vmul.f32 %v1897_v9, %v1897_v9  ;;  %v3686_v46 = vld [vmem:[#allocation4_spill] sm:$0xff] }
 0x173   : > { %v1715_v53 = vpop.f32.mrf.mxu1  ;;  %v1850_v45 = vpop.f32.mrf.mxu0  ;;  %v1499_v33 = vadd.f32 %v3682_v0, %v1367_v39  ;;  %v1624_v38 = vadd.f32 %v3684_v29, %v1498_v34  ;;  %v1368_v42 = vadd.f32 %v3686_v46, %v1220_v5  ;;  %v3697_v46 = vld [vmem:[#allocation23_spill] sm:$0xff] }
 0x174   : > { %2426 = vst [vmem:[%s3584_s25 + $0x8] sm:$0xff] %v2394_v19   ;;  %v1910_v50 = vadd.f32 %v1895_v61, %v1894_v58  ;;  %v1932_v56 = vmul.f32 %v1895_v61, %v1895_v61  ;;  %v2389_v12 = vpack.c.bf16 %v1895_v61, %v1894_v58  ;;  %v1766_v17 = vadd.f32 %v1715_v53, %v1618_v44  ;;  %v3689_v19 = vld [vmem:[#allocation8_spill] sm:$0xff]  ;;  %v3690_v44 = vld [vmem:[#allocation15_spill] sm:$0xff] }
 0x175   : > { %v2649_v54 = vpop.f32.mrf.mxu1  ;;  %v2670_v14 = vpop.f32.mrf.mxu0  ;;  %v1900_v21 = vadd.f32 %v2666_v59, %v1768_v8  ;;  %v1625_v57 = vadd.f32 %v3690_v44, %v1499_v33  ;;  %v3691_v8 = vld [vmem:[#allocation21_spill] sm:$0xff]  ;;  %v3694_v33 = vld [vmem:[#allocation19_spill] sm:$0xff] }
 0x176   : > { %v1911_v1 = vadd.f32 %v1910_v50, %v1896_v16  ;;  %v1947_v60 = vadd.f32 %v1932_v56, %v1931_v36  ;;  %2390 = vst [vmem:[%s3584_s25] sm:$0xff] %v2389_v12   ;;  %v1769_v35 = vadd.f32 %v2649_v54, %v1621_v15  ;;  %v1898_v37 = vadd.f32 %v1847_v43, %v1766_v17  ;;  %v3692_v12 = vld [vmem:[#allocation17_spill] sm:$0xff] }
 0x177   : > { %v1718_v32 = vpop.f32.mrf.mxu1  ;;  %v1863_v48 = vpop.f32.mrf.mxu0  ;;  %v1502_v53 = vadd.f32 %v3691_v8, %v1370_v51  ;;  %v1623_v55 = vadd.f32 %v3692_v12, %v1497_v41  ;;  %v1937_v34 = vmul.f32 %v1900_v21, %v1900_v21  ;;  %v3696_v51 = vld [vmem:[#allocation22_spill] sm:$0xff] }
 0x178   : > { %v1948_v27 = vadd.f32 %v1947_v60, %v1933_v31  ;;  %v1912_v11 = vadd.f32 %v1911_v1, %v1897_v9  ;;  %v1901_v62 = vadd.f32 %v2667_v20, %v1769_v35  ;;  %v1767_v18 = vadd.f32 %v1718_v32, %v1619_v3  ;;  %v3687_v9 = vld [vmem:[#allocation5_spill] sm:$0xff]  ;;  %v3688_v20 = vld [vmem:[#allocation2_spill] sm:$0xff] }
 0x179   : > { %v2652_v16 = vpop.f32.mrf.mxu1  ;;  %v2671_v58 = vpop.f32.mrf.mxu0  ;;  %v1935_v59 = vmul.f32 %v1898_v37, %v1898_v37  ;;  %v1371_v4 = vadd.f32 %v3687_v9, %v1223_v52  ;;  %v1221_v2 = vadd.f32 %v3689_v19, %v3688_v20  ;;  %v3693_v31 = vld [vmem:[#allocation6_spill] sm:$0xff] }
 0x17a   : > { %v1913_v6 = vadd.f32 %v1912_v11, %v1898_v37  ;;  %v1949_v43 = vadd.f32 %v1948_v27, %v1934_v22  ;;  %v2404_v39 = vpack.c.bf16 %v1901_v62, %v1900_v21  ;;  %v1899_v61 = vadd.f32 %v1850_v45, %v1767_v18  ;;  %v3695_v11 = vld [vmem:[#allocation20_spill] sm:$0xff] }
 0x17b   : > { %v1731_v24 = vpop.f32.mrf.mxu1  ;;  %v1866_v26 = vpop.f32.mrf.mxu0  ;;  %v1772_v40 = vadd.f32 %v2652_v16, %v1624_v38  ;;  %v1500_v45 = vadd.f32 %v3534_v23, %v1368_v42  ;;  %v1503_v3 = vadd.f32 %v3542_v49, %v1371_v4  ;;  %v1369_v1 = vadd.f32 %v3693_v31, %v1221_v2 }
 0x17c   : > { %v1950_v15 = vadd.f32 %v1949_v43, %v1935_v59  ;;  %2428 = vst [vmem:[%s3584_s25 + $0x18] sm:$0xff] %v2404_v39   ;;  %v1770_v7 = vadd.f32 %v1731_v24, %v1622_v28  ;;  %v1914_v36 = vadd.f32 %v1913_v6, %v1899_v61  ;;  %v1936_v50 = vmul.f32 %v1899_v61, %v1899_v61 }
 0x17d   : > { %v2399_v5 = vpack.c.bf16 %v1899_v61, %v1898_v37  ;;  %v2653_v56 = vpop.f32.mrf.mxu1  ;;  %v2674_v52 = vpop.f32.mrf.mxu0  ;;  %v1904_v60 = vadd.f32 %v2670_v14, %v1772_v40  ;;  %v1628_v22 = vadd.f32 %v3694_v33, %v1502_v53  ;;  %v1938_v37 = vmul.f32 %v1901_v62, %v1901_v62 }
 0x17e   : > { %v1773_v25 = vadd.f32 %v2653_v56, %v1625_v57  ;;  %v1915_v30 = vadd.f32 %v1914_v36, %v1900_v21  ;;  %v1951_v13 = vadd.f32 %v1950_v15, %v1936_v50  ;;  %v1902_v17 = vadd.f32 %v1863_v48, %v1770_v7 }
 0x17f   : > { %2427 = vst [vmem:[%s3584_s25 + $0x10] sm:$0xff] %v2399_v5   ;;  %v1734_v54 = vpop.f32.mrf.mxu1  ;;  %v1879_v49 = vpop.f32.mrf.mxu0  ;;  %v1626_v18 = vadd.f32 %v3695_v11, %v1500_v45  ;;  %v1501_v21 = vadd.f32 %v3547_v47, %v1369_v1  ;;  %v1629_v29 = vadd.f32 %v3696_v51, %v1503_v3  ;;  %v1941_v9 = vmul.f32 %v1904_v60, %v1904_v60 }
 0x180   : > { %v1905_v35 = vadd.f32 %v2671_v58, %v1773_v25  ;;  %v1771_v0 = vadd.f32 %v1734_v54, %v1623_v55  ;;  %v1952_v32 = vadd.f32 %v1951_v13, %v1937_v34  ;;  %v1916_v23 = vadd.f32 %v1915_v30, %v1901_v62 }
 0x181   : > { %v2656_v27 = vpop.f32.mrf.mxu1  ;;  %v1939_v38 = vmul.f32 %v1902_v17, %v1902_v17  ;;  %v2675_v39 = vpop.f32.mrf.mxu0  ;;  %v1627_v47 = vadd.f32 %v3697_v46, %v1501_v21 }
 0x182   : > { %v2414_v10 = vpack.c.bf16 %v1905_v35, %v1904_v60  ;;  %v1903_v48 = vadd.f32 %v1866_v26, %v1771_v0  ;;  %v1917_v14 = vadd.f32 %v1916_v23, %v1902_v17  ;;  %v1953_v63 = vadd.f32 %v1952_v32, %v1938_v37 }
 0x183   : > { %v1747_v28 = vpop.f32.mrf.mxu1  ;;  %v1776_v58 = vadd.f32 %v2656_v27, %v1628_v22  ;;  %v1942_v44 = vmul.f32 %v1905_v35, %v1905_v35  ;;  %v1882_v40 = vpop.f32.mrf.mxu0 }
 0x184   : > { %2430 = vst [vmem:[%s3584_s25 + $0x28] sm:$0xff] %v2414_v10   ;;  %v1940_v41 = vmul.f32 %v1903_v48, %v1903_v48  ;;  %v2409_v16 = vpack.c.bf16 %v1903_v48, %v1902_v17  ;;  %v1774_v62 = vadd.f32 %v1747_v28, %v1626_v18  ;;  %v1954_v6 = vadd.f32 %v1953_v63, %v1939_v38 }
 0x185   : > { %v1918_v59 = vadd.f32 %v1917_v14, %v1903_v48  ;;  %v2657_v43 = vpop.f32.mrf.mxu1  ;;  %v1908_v61 = vadd.f32 %v2674_v52, %v1776_v58 }
 0x186   : > { %2429 = vst [vmem:[%s3584_s25 + $0x20] sm:$0xff] %v2409_v16   ;;  %v1777_v42 = vadd.f32 %v2657_v43, %v1629_v29  ;;  %v1955_v20 = vadd.f32 %v1954_v6, %v1940_v41  ;;  %v1906_v19 = vadd.f32 %v1879_v49, %v1774_v62 }
 0x187   : > { %v1919_v4 = vadd.f32 %v1918_v59, %v1904_v60  ;;  %v1750_v2 = vpop.f32.mrf.mxu1  ;;  %v1945_v52 = vmul.f32 %v1908_v61, %v1908_v61 }
 0x188   : > { %v1909_v24 = vadd.f32 %v2675_v39, %v1777_v42  ;;  %v1775_v26 = vadd.f32 %v1750_v2, %v1627_v47  ;;  %v1956_v57 = vadd.f32 %v1955_v20, %v1941_v9  ;;  %v1943_v36 = vmul.f32 %v1906_v19, %v1906_v19 }
 0x189   : > { %v1920_v15 = vadd.f32 %v1919_v4, %v1905_v35 }
 0x18a   : > { %v2424_v7 = vpack.c.bf16 %v1909_v24, %v1908_v61  ;;  %v1907_v8 = vadd.f32 %v1882_v40, %v1775_v26  ;;  %v1957_v50 = vadd.f32 %v1956_v57, %v1942_v44  ;;  %v1946_v25 = vmul.f32 %v1909_v24, %v1909_v24 }
 0x18b   : > { %v1921_v53 = vadd.f32 %v1920_v15, %v1906_v19 }
 0x18c   : > { %2432 = vst [vmem:[%s3584_s25 + $0x38] sm:$0xff] %v2424_v7   ;;  %v1944_v5 = vmul.f32 %v1907_v8, %v1907_v8  ;;  %v2419_v56 = vpack.c.bf16 %v1907_v8, %v1906_v19  ;;  %v1958_v12 = vadd.f32 %v1957_v50, %v1943_v36 }
 0x18d   : > { %v1922_v55 = vadd.f32 %v1921_v53, %v1907_v8 }
 0x18e   : > { %2431 = vst [vmem:[%s3584_s25 + $0x30] sm:$0xff] %v2419_v56   ;;  %v1959_v3 = vadd.f32 %v1958_v12, %v1944_v5 }
 0x18f   : > { %v1923_v45 = vadd.f32 %v1922_v55, %v1908_v61 }
 0x190   : > { %v1960_v30 = vadd.f32 %v1959_v3, %v1945_v52 }
 0x191   : > { %v1924_v34 = vadd.f32 %v1923_v45, %v1909_v24 }
 0x192   : > { %v1961_v17 = vadd.f32 %v1960_v30, %v1946_v25 }
 0x193   : > { %v1925_v13 = vrot.slane %v1924_v34, 4 }
 0x194   : > { %v1962_v31 = vrot.slane %v1961_v17, 4 }
 0x195   : > { %v1926_v54 = vadd.f32 %v1925_v13, %v1924_v34 }
 0x196   : > { %v1963_v60 = vadd.f32 %v1962_v31, %v1961_v17 }
 0x197   : > { %v1927_v1 = vrot.slane %v1926_v54, 2 }
 0x198   : > { %v1964_v0 = vrot.slane %v1963_v60, 2 }
 0x199   : > { %v1928_v35 = vadd.f32 %v1927_v1, %v1926_v54 }
 0x19a   : > { %v1965_v22 = vadd.f32 %v1964_v0, %v1963_v60 }
 0x19b   : > { %v1929_v33 = vrot.slane %v1928_v35, 1 }
 0x19c   : > { %v1966_v37 = vrot.slane %v1965_v22, 1 }
 0x19d   : > { %v1930_v32 = vadd.f32 %v1929_v33, %v1928_v35 }
 0x19e   : > { %v1967_v23 = vadd.f32 %v1966_v37, %v1965_v22 }
 0x1a0   : > { %v1969_v27 = vsel %vm1968_vm8, %v1930_v32, %v1967_v23 }
 0x1a1   : > { %1970 = vst [vmem:[%s321_s5] sm:$0x3] %v1969_v27 }
 0x1a2 PF: > { %s15_s19 = sadd.s32 1, %s2780_s19   ;;  %s3698_s15 = smov %s2772_s17 }
 0x1a3   : > { %p12_p9 = scmp.ge.s32.totalorder %s15_s19, 6   ;;  %s3699_s16 = smov %s2776_s18 }
 0x1a4   : > { %s3700_s17 = smov %s3703_s20  ;;  %s3701_s18 = smov %s3707_s21 }
 0x1a5   :  { %14 = sbr.rel (!%p12_p9) target bundleno = 3 (0x3), region = 85 }

</bundles_post_ra>
